<compile_context>
chip_gen: v5e
topology: v5e:2x2
jax: 0.10.0
libtpu: 0.0.40
codegen_flags: <defaults>
</compile_context>

<pallas_src>
from typing import NamedTuple

import jax
import jax.numpy as jnp
from jax.experimental import pallas as pl
from jax.experimental.pallas import tpu as pltpu


class DETRTrackConfig(NamedTuple):
    hidden_dim: int
    num_queries: int
    num_dec_layers: int
    num_classes_p1: int
    head_out_lanes: int
    index_feedforward: int
    track_on: bool
    aux_loss: bool


# ----------------------------------------------------------------------------
# Fused Pallas kernel: projection -> decoder stand-in -> heads, per batch elem.
# ----------------------------------------------------------------------------
def _detrtrack_kernel(x_ref, pos_ref, bias_ref, qe_ref, tgt_ref,
                      pw_ref, pb_ref, dec_w_ref, dec_b_ref,
                      wx_ref, bx_ref, w1_ref, b1_ref, w2_ref, b2_ref,
                      wh_ref, bh_ref, bmask_ref,
                      heads_ref, hs_last_ref):
    f32 = jnp.float32

    x = x_ref[0]                                  # (S, Cin)
    # Backbone-stub 1x1 conv + input_proj, precomposed into one matmul.
    mem = jnp.dot(x, pw_ref[...], preferred_element_type=f32) + pb_ref[...]
    mem = mem + pos_ref[0]                        # (S, D)
    mem_t = mem.T                                 # (D, S), transposed once, reused

    bias = bias_ref[0]                            # (1, S) additive key-padding mask
    qe = qe_ref[...]                              # (Q, D)
    h = tgt_ref[0]                                # (Q, D)

    dec_w = dec_w_ref[...]                        # (L, D, D)
    dec_b = dec_b_ref[...]                        # (L, 1, D)
    wx = wx_ref[...]
    bx = bx_ref[...]
    w1 = w1_ref[...]
    b1 = b1_ref[...]
    w2 = w2_ref[...]
    b2 = b2_ref[...]
    wh = wh_ref[...]
    bh = bh_ref[...]
    bmask = bmask_ref[...]                        # (1, NL) bbox-lane 0/1 mask

    d = h.shape[-1]
    scale = 1.0 / jnp.sqrt(jnp.float32(d))
    num_layers = dec_w.shape[0]

    # TODO(synk): at real DETR depth (L=6, D=256) switch to
    # lax.fori_loop(..., unroll=True) to bound vreg live ranges.
    for l in range(num_layers):
        # --- decoder stand-in layer (cross-attention + tanh update) ---
        q = h + qe
        logits = jnp.dot(q, mem_t, preferred_element_type=f32) * scale   # (Q, S)
        logits = logits + bias
        m = jnp.max(logits, axis=-1, keepdims=True)
        p = jnp.exp(logits - m)                                          # EUP
        attn = p * pl.reciprocal(jnp.sum(p, axis=-1, keepdims=True), approx=True)
        ctx = jnp.dot(attn, mem, preferred_element_type=f32)             # (Q, D)
        upd = jnp.dot(ctx, dec_w[l], preferred_element_type=f32)
        h = jnp.tanh(h + upd + dec_b[l])

        # --- fused class / bbox-MLP / track heads on this layer's h ---
        xpart = jnp.dot(h, wx, preferred_element_type=f32) + bx          # (Q, NL)
        t = jnp.maximum(jnp.dot(h, w1, preferred_element_type=f32) + b1, 0.0)
        t = jnp.maximum(jnp.dot(t, w2, preferred_element_type=f32) + b2, 0.0)
        hpart = jnp.dot(t, wh, preferred_element_type=f32) + bh          # (Q, NL)
        # lanes [0:nc]=class logits, [nc:nc+4]=sigmoid(bbox), [nc+4:nc+5]=track,
        # rest zero padding -> one lane-dense unmasked (Q, 128) store.
        slab = xpart + bmask * jax.nn.sigmoid(hpart)
        heads_ref[l] = slab[None].astype(heads_ref.dtype)

    hs_last_ref[0] = h.astype(hs_last_ref.dtype)


def detrtrack_fused_pallas(cfg, params, x_bsc, pos_bsd, bias_b1s, tgt_bqd):
    B, S, Cin = x_bsc.shape
    D = cfg.hidden_dim
    Q = cfg.num_queries
    L = cfg.num_dec_layers
    NL = cfg.head_out_lanes
    H = D  # bbox MLP hidden width == hidden_dim

    heads, hs_last = pl.pallas_call(
        _detrtrack_kernel,
        out_shape=(
            jax.ShapeDtypeStruct((L, B, Q, NL), jnp.float32),   # fused head slab
            jax.ShapeDtypeStruct((B, Q, D), jnp.float32),       # hs[-1] (pre_embed)
        ),
        grid=(B,),
        in_specs=[
            pl.BlockSpec((1, S, Cin), lambda b: (b, 0, 0)),     # backbone features
            pl.BlockSpec((1, S, D), lambda b: (b, 0, 0)),       # pos embedding
            pl.BlockSpec((1, 1, S), lambda b: (b, 0, 0)),       # key-padding bias
            pl.BlockSpec((Q, D), lambda b: (0, 0)),             # query_embed
            pl.BlockSpec((1, Q, D), lambda b: (b, 0, 0)),       # tgt / pre_embed
            pl.BlockSpec((Cin, D), lambda b: (0, 0)),           # fused proj weight
            pl.BlockSpec((1, D), lambda b: (0, 0)),             # fused proj bias
            pl.BlockSpec((L, D, D), lambda b: (0, 0, 0)),       # decoder weights
            pl.BlockSpec((L, 1, D), lambda b: (0, 0, 0)),       # decoder biases
            pl.BlockSpec((D, NL), lambda b: (0, 0)),            # class+track (padded)
            pl.BlockSpec((1, NL), lambda b: (0, 0)),
            pl.BlockSpec((D, H), lambda b: (0, 0)),             # bbox MLP layer 1
            pl.BlockSpec((1, H), lambda b: (0, 0)),
            pl.BlockSpec((H, H), lambda b: (0, 0)),             # bbox MLP layer 2
            pl.BlockSpec((1, H), lambda b: (0, 0)),
            pl.BlockSpec((H, NL), lambda b: (0, 0)),            # bbox layer 3 (padded)
            pl.BlockSpec((1, NL), lambda b: (0, 0)),
            pl.BlockSpec((1, NL), lambda b: (0, 0)),            # bbox lane mask
        ],
        out_specs=(
            pl.BlockSpec((L, 1, Q, NL), lambda b: (0, b, 0, 0)),
            pl.BlockSpec((1, Q, D), lambda b: (b, 0, 0)),
        ),
        compiler_params=pltpu.CompilerParams(
            dimension_semantics=("parallel",),   # batch-independent -> 2nd TC on v7x
        ),
    )(x_bsc, pos_bsd, bias_b1s, params["query_embed"], tgt_bqd,
      params["proj_w"], params["proj_b"], params["dec_w"], params["dec_b"],
      params["head_wx"], params["head_bx"],
      params["bbox_w1"], params["bbox_b1"], params["bbox_w2"], params["bbox_b2"],
      params["head_wh"], params["head_bh"], params["bbox_lane_mask"])
    return heads, hs_last


# ----------------------------------------------------------------------------
# Deterministic stand-ins for external modules (backbone / positional encoding)
# ----------------------------------------------------------------------------
def sine_pos_embed_cl(B, H, W, D):
    """Deterministic sinusoidal positional embedding, channels-last [B,H,W,D]."""
    half = D // 2
    y = jnp.arange(H, dtype=jnp.float32)[:, None, None]
    x = jnp.arange(W, dtype=jnp.float32)[None, :, None]
    dim_t = 10000.0 ** (2.0 * (jnp.arange(half) // 2) / half)
    pos_x = x / dim_t
    pos_y = y / dim_t
    pos_x = jnp.concatenate([jnp.sin(pos_x[..., 0::2]), jnp.cos(pos_x[..., 1::2])], -1)
    pos_y = jnp.concatenate([jnp.sin(pos_y[..., 0::2]), jnp.cos(pos_y[..., 1::2])], -1)
    pos = jnp.concatenate(
        [jnp.broadcast_to(pos_y, (H, W, half)), jnp.broadcast_to(pos_x, (H, W, half))],
        axis=-1,
    )
    return jnp.broadcast_to(pos[None], (B, H, W, D))


def backbone_stub(cfg, tensor_nchw, mask):
    # TODO(synk): real ResNet backbone not provided; deterministic 2x downsample
    # + sinusoidal positional embedding only.  Its purely linear 1x1 projection
    # is precomposed with DETR's input_proj in make_params.
    x_nhwc = jnp.transpose(tensor_nchw, (0, 2, 3, 1))[:, ::2, ::2, :]   # [B,Hs,Ws,3]
    m = mask[:, ::2, ::2]                                               # [B,Hs,Ws]
    B, Hs, Ws, _ = x_nhwc.shape
    pos = sine_pos_embed_cl(B, Hs, Ws, cfg.hidden_dim)
    return [(x_nhwc, m)], [pos]


# ----------------------------------------------------------------------------
# DETRTRACK forward
# ----------------------------------------------------------------------------
def _detrtrack_forward(cfg, params, samples_tensor, samples_mask, pre_embed=None):
    # track_on and first frame: drop the previous-frame channels.
    if cfg.track_on and pre_embed is None:
        samples_tensor = samples_tensor[:, 3:, :, :]

    features, pos = backbone_stub(cfg, samples_tensor, samples_mask)
    src_nhwc, mask_ds = features[cfg.index_feedforward]
    pos_l = pos[cfg.index_feedforward]

    B, Hs, Ws, Cin = src_nhwc.shape
    S = Hs * Ws
    D = cfg.hidden_dim
    Q = cfg.num_queries

    # channels-last end-to-end; single contiguous reshapes at the boundary.
    x_bsc = src_nhwc.reshape(B, S, Cin)
    pos_bsd = pos_l.reshape(B, S, D)
    bias_b1s = jnp.where(mask_ds.reshape(B, 1, S), -1e9, 0.0).astype(jnp.float32)
    tgt = pre_embed if pre_embed is not None else jnp.zeros((B, Q, D), jnp.float32)

    # TODO(synk): full DETR encoder/decoder not provided; the kernel uses a
    # deterministic simplified cross-attention decoder stand-in, fused with the
    # input projection and the class/bbox/track heads.
    heads, hs_last = detrtrack_fused_pallas(cfg, params, x_bsc, pos_bsd, bias_b1s, tgt)

    nc = cfg.num_classes_p1
    outputs_class = heads[..., :nc]               # (L, B, Q, nc)
    outputs_coord = heads[..., nc:nc + 4]         # (L, B, Q, 4)
    out = {"pred_logits": outputs_class[-1], "pred_boxes": outputs_coord[-1]}

    outputs_track = None
    if cfg.track_on:
        outputs_track = heads[..., nc + 4:nc + 5]  # (L, B, Q, 1)
        out["pred_tracks"] = outputs_track[-1]

    if cfg.aux_loss:
        if cfg.track_on:
            out["aux_outputs"] = [
                {"pred_logits": a, "pred_boxes": b, "pred_tracks": c}
                for a, b, c in zip(outputs_class[:-1], outputs_coord[:-1],
                                   outputs_track[:-1])
            ]
        else:
            out["aux_outputs"] = [
                {"pred_logits": a, "pred_boxes": b}
                for a, b in zip(outputs_class[:-1], outputs_coord[:-1])
            ]

    pre_embed_out = jax.lax.stop_gradient(hs_last)   # hs[-1].detach()
    return out, pre_embed_out


detrtrack_forward = jax.jit(_detrtrack_forward, static_argnums=(0,))


# ----------------------------------------------------------------------------
# Deterministic parameter construction (one-time weight prep / padding)
# ----------------------------------------------------------------------------
def make_params(key, *, num_backbone_channels=8, hidden_dim=32, num_classes=4,
                num_queries=8, num_dec_layers=3, track_on=True, aux_loss=True,
                head_out_lanes=128, index_feedforward=0):
    ks = jax.random.split(key, 16)
    s = 0.02

    def rnd(k, shape):
        return (s * jax.random.normal(k, shape)).astype(jnp.float32)

    nc = num_classes + 1
    assert head_out_lanes >= nc + 5

    # Backbone-stub 1x1 conv (3 -> C) and input_proj (C -> D): purely linear,
    # precomposed once (numerics differ only by f32 reassociation).
    # TODO(synk): drop precomposition if a real nonlinear backbone is used.
    bb_w = rnd(ks[0], (3, num_backbone_channels))
    bb_b = rnd(ks[1], (num_backbone_channels,))
    ip_w = rnd(ks[2], (num_backbone_channels, hidden_dim))
    ip_b = rnd(ks[3], (hidden_dim,))
    proj_w = (bb_w @ ip_w).astype(jnp.float32)
    proj_b = (bb_b @ ip_w + ip_b).reshape(1, hidden_dim).astype(jnp.float32)

    class_w = rnd(ks[5], (hidden_dim, nc))
    class_b = rnd(ks[6], (nc,))
    bbox_w3 = rnd(ks[11], (hidden_dim, 4))
    bbox_b3 = rnd(ks[12], (4,))
    track_w = rnd(ks[13], (hidden_dim, 1))
    track_b = rnd(ks[14], (1,))

    # Lane-dense head slab layout: [class | bbox | track | zero pad], width 128.
    # Padding lanes are exactly zero by construction of these weights/biases.
    wx = jnp.zeros((hidden_dim, head_out_lanes), jnp.float32)
    bx = jnp.zeros((1, head_out_lanes), jnp.float32)
    wx = wx.at[:, :nc].set(class_w)
    bx = bx.at[:, :nc].set(class_b[None, :])
    if track_on:
        wx = wx.at[:, nc + 4:nc + 5].set(track_w)
        bx = bx.at[:, nc + 4:nc + 5].set(track_b[None, :])
    wh = jnp.zeros((hidden_dim, head_out_lanes), jnp.float32)
    bh = jnp.zeros((1, head_out_lanes), jnp.float32)
    wh = wh.at[:, nc:nc + 4].set(bbox_w3)
    bh = bh.at[:, nc:nc + 4].set(bbox_b3[None, :])
    lane = jnp.arange(head_out_lanes)
    bbox_lane_mask = ((lane >= nc) & (lane < nc + 4)).astype(jnp.float32)[None, :]

    cfg = DETRTrackConfig(
        hidden_dim=hidden_dim, num_queries=num_queries,
        num_dec_layers=num_dec_layers, num_classes_p1=nc,
        head_out_lanes=head_out_lanes, index_feedforward=index_feedforward,
        track_on=track_on, aux_loss=aux_loss,
    )
    params = {
        "proj_w": proj_w, "proj_b": proj_b,
        "query_embed": rnd(ks[4], (num_queries, hidden_dim)),
        "bbox_w1": rnd(ks[7], (hidden_dim, hidden_dim)),
        "bbox_b1": rnd(ks[8], (hidden_dim,)).reshape(1, hidden_dim),
        "bbox_w2": rnd(ks[9], (hidden_dim, hidden_dim)),
        "bbox_b2": rnd(ks[10], (hidden_dim,)).reshape(1, hidden_dim),
        "head_wx": wx, "head_bx": bx, "head_wh": wh, "head_bh": bh,
        "bbox_lane_mask": bbox_lane_mask,
        "dec_w": rnd(ks[15], (num_dec_layers, hidden_dim, hidden_dim)),
        "dec_b": jnp.zeros((num_dec_layers, 1, hidden_dim), jnp.float32),
    }
    return cfg, params


# ----------------------------------------------------------------------------
if __name__ == "__main__":
    key = jax.random.PRNGKey(0)
    pkey, xkey = jax.random.split(key)

    B, H, W = 2, 16, 16
    cfg, params = make_params(pkey, hidden_dim=32, num_classes=4, num_queries=8,
                              num_dec_layers=3, track_on=True, aux_loss=True)

    # track_on=True: input has 6 channels (current + previous frame);
    # forward slices [:, 3:, :, :] when pre_embed is None.
    samples_tensor = jax.random.normal(xkey, (B, 6, H, W), dtype=jnp.float32)
    samples_mask = jnp.zeros((B, H, W), dtype=jnp.bool_)   # no padding

    # First call (pre_embed=None), then second call reusing pre_embed (tracking).
    out, pre_embed = detrtrack_forward(cfg, params, samples_tensor, samples_mask, None)
    out2, pre_embed2 = detrtrack_forward(cfg, params, samples_tensor[:, :3],
                                         samples_mask, pre_embed)

    jax.block_until_ready((out, pre_embed, out2, pre_embed2))

    # Sanity: shape checks matching DETRTRACK semantics.
    assert out["pred_logits"].shape == (B, 8, 5)
    assert out["pred_boxes"].shape == (B, 8, 4)
    assert out["pred_tracks"].shape == (B, 8, 1)
    assert pre_embed.shape == (B, 8, 32)
    assert len(out["aux_outputs"]) == 2
    assert out2["pred_logits"].shape == (B, 8, 5)
    assert pre_embed2.shape == (B, 8, 32)
    assert bool(jnp.all((out["pred_boxes"] >= 0.0) & (out["pred_boxes"] <= 1.0)))
    assert bool(jnp.all(jnp.isfinite(out["pred_logits"])))

    print("KERNEL_OK")
</pallas_src>

<mosaic_0001>
module attributes {stable_mosaic.version = 11 : i64} {
  func.func @_detrtrack_kernel(%arg0: i32, %arg1: memref<1x64x3xf32, #tpu.memory_space<vmem>>, %arg2: memref<1x64x32xf32, #tpu.memory_space<vmem>>, %arg3: memref<1x1x64xf32, #tpu.memory_space<vmem>>, %arg4: memref<8x32xf32, #tpu.memory_space<vmem>>, %arg5: memref<1x8x32xf32, #tpu.memory_space<vmem>>, %arg6: memref<3x32xf32, #tpu.memory_space<vmem>>, %arg7: memref<1x32xf32, #tpu.memory_space<vmem>>, %arg8: memref<3x32x32xf32, #tpu.memory_space<vmem>>, %arg9: memref<3x1x32xf32, #tpu.memory_space<vmem>>, %arg10: memref<32x128xf32, #tpu.memory_space<vmem>>, %arg11: memref<1x128xf32, #tpu.memory_space<vmem>>, %arg12: memref<32x32xf32, #tpu.memory_space<vmem>>, %arg13: memref<1x32xf32, #tpu.memory_space<vmem>>, %arg14: memref<32x32xf32, #tpu.memory_space<vmem>>, %arg15: memref<1x32xf32, #tpu.memory_space<vmem>>, %arg16: memref<32x128xf32, #tpu.memory_space<vmem>>, %arg17: memref<1x128xf32, #tpu.memory_space<vmem>>, %arg18: memref<1x128xf32, #tpu.memory_space<vmem>>, %arg19: memref<3x1x8x128xf32, #tpu.memory_space<vmem>>, %arg20: memref<1x8x32xf32, #tpu.memory_space<vmem>>) attributes {dimension_semantics = [#tpu.dimension_semantics<parallel>], iteration_bounds = array<i64: 2>, scalar_prefetch = 0 : i64, scratch_operands = 0 : i64, tpu.core_type = #tpu.core_type<tc>, window_params = [{transform_indices = @transform_0, window_bounds = array<i64: 1, 64, 3>}, {transform_indices = @transform_1, window_bounds = array<i64: 1, 64, 32>}, {transform_indices = @transform_2, window_bounds = array<i64: 1, 1, 64>}, {pipeline_mode = #tpu.pipeline_mode<synchronous>, transform_indices = @transform_3, window_bounds = array<i64: 8, 32>}, {transform_indices = @transform_4, window_bounds = array<i64: 1, 8, 32>}, {pipeline_mode = #tpu.pipeline_mode<synchronous>, transform_indices = @transform_5, window_bounds = array<i64: 3, 32>}, {pipeline_mode = #tpu.pipeline_mode<synchronous>, transform_indices = @transform_6, window_bounds = array<i64: 1, 32>}, {pipeline_mode = #tpu.pipeline_mode<synchronous>, transform_indices = @transform_7, window_bounds = array<i64: 3, 32, 32>}, {pipeline_mode = #tpu.pipeline_mode<synchronous>, transform_indices = @transform_8, window_bounds = array<i64: 3, 1, 32>}, {pipeline_mode = #tpu.pipeline_mode<synchronous>, transform_indices = @transform_9, window_bounds = array<i64: 32, 128>}, {pipeline_mode = #tpu.pipeline_mode<synchronous>, transform_indices = @transform_10, window_bounds = array<i64: 1, 128>}, {pipeline_mode = #tpu.pipeline_mode<synchronous>, transform_indices = @transform_11, window_bounds = array<i64: 32, 32>}, {pipeline_mode = #tpu.pipeline_mode<synchronous>, transform_indices = @transform_12, window_bounds = array<i64: 1, 32>}, {pipeline_mode = #tpu.pipeline_mode<synchronous>, transform_indices = @transform_13, window_bounds = array<i64: 32, 32>}, {pipeline_mode = #tpu.pipeline_mode<synchronous>, transform_indices = @transform_14, window_bounds = array<i64: 1, 32>}, {pipeline_mode = #tpu.pipeline_mode<synchronous>, transform_indices = @transform_15, window_bounds = array<i64: 32, 128>}, {pipeline_mode = #tpu.pipeline_mode<synchronous>, transform_indices = @transform_16, window_bounds = array<i64: 1, 128>}, {pipeline_mode = #tpu.pipeline_mode<synchronous>, transform_indices = @transform_17, window_bounds = array<i64: 1, 128>}, {transform_indices = @transform_18, window_bounds = array<i64: 3, 1, 8, 128>}, {transform_indices = @transform_19, window_bounds = array<i64: 1, 8, 32>}]} {
    %c0 = arith.constant 0 : index
    %c0_0 = arith.constant 0 : index
    %c0_1 = arith.constant 0 : index
    %0 = vector.load %arg1[%c0, %c0_0, %c0_1] : memref<1x64x3xf32, #tpu.memory_space<vmem>>, vector<1x64x3xf32>
    %1 = vector.shape_cast %0 : vector<1x64x3xf32> to vector<64x3xf32>
    %c0_2 = arith.constant 0 : index
    %c0_3 = arith.constant 0 : index
    %2 = vector.load %arg6[%c0_2, %c0_3] : memref<3x32xf32, #tpu.memory_space<vmem>>, vector<3x32xf32>
    %cst = arith.constant dense<0.000000e+00> : vector<64x32xf32>
    %3 = tpu.matmul %1, %2, %cst {dimension_numbers = #tpu.dot_dimension_numbers<[1], [0], [0], [1], [0, 0, 1, 1], [], []>} : vector<64x3xf32>, vector<3x32xf32>, vector<64x32xf32> -> vector<64x32xf32>
    %c0_4 = arith.constant 0 : index
    %c0_5 = arith.constant 0 : index
    %4 = vector.load %arg7[%c0_4, %c0_5] : memref<1x32xf32, #tpu.memory_space<vmem>>, vector<1x32xf32>
    %5 = vector.broadcast %4 : vector<1x32xf32> to vector<64x32xf32>
    %6 = arith.addf %3, %5 : vector<64x32xf32>
    %c0_6 = arith.constant 0 : index
    %c0_7 = arith.constant 0 : index
    %c0_8 = arith.constant 0 : index
    %7 = vector.load %arg2[%c0_6, %c0_7, %c0_8] : memref<1x64x32xf32, #tpu.memory_space<vmem>>, vector<1x64x32xf32>
    %8 = vector.shape_cast %7 : vector<1x64x32xf32> to vector<64x32xf32>
    %9 = arith.addf %6, %8 : vector<64x32xf32>
    %10 = tpu.transpose %9, [1, 0] : vector<64x32xf32> -> vector<32x64xf32>
    %c0_9 = arith.constant 0 : index
    %c0_10 = arith.constant 0 : index
    %c0_11 = arith.constant 0 : index
    %11 = vector.load %arg3[%c0_9, %c0_10, %c0_11] : memref<1x1x64xf32, #tpu.memory_space<vmem>>, vector<1x1x64xf32>
    %12 = vector.shape_cast %11 : vector<1x1x64xf32> to vector<1x64xf32>
    %c0_12 = arith.constant 0 : index
    %c0_13 = arith.constant 0 : index
    %13 = vector.load %arg4[%c0_12, %c0_13] : memref<8x32xf32, #tpu.memory_space<vmem>>, vector<8x32xf32>
    %c0_14 = arith.constant 0 : index
    %c0_15 = arith.constant 0 : index
    %c0_16 = arith.constant 0 : index
    %14 = vector.load %arg5[%c0_14, %c0_15, %c0_16] : memref<1x8x32xf32, #tpu.memory_space<vmem>>, vector<1x8x32xf32>
    %15 = vector.shape_cast %14 : vector<1x8x32xf32> to vector<8x32xf32>
    %c0_17 = arith.constant 0 : index
    %c0_18 = arith.constant 0 : index
    %c0_19 = arith.constant 0 : index
    %16 = vector.load %arg8[%c0_17, %c0_18, %c0_19] : memref<3x32x32xf32, #tpu.memory_space<vmem>>, vector<3x32x32xf32>
    %c0_20 = arith.constant 0 : index
    %c0_21 = arith.constant 0 : index
    %c0_22 = arith.constant 0 : index
    %17 = vector.load %arg9[%c0_20, %c0_21, %c0_22] : memref<3x1x32xf32, #tpu.memory_space<vmem>>, vector<3x1x32xf32>
    %c0_23 = arith.constant 0 : index
    %c0_24 = arith.constant 0 : index
    %18 = vector.load %arg10[%c0_23, %c0_24] : memref<32x128xf32, #tpu.memory_space<vmem>>, vector<32x128xf32>
    %c0_25 = arith.constant 0 : index
    %c0_26 = arith.constant 0 : index
    %19 = vector.load %arg11[%c0_25, %c0_26] : memref<1x128xf32, #tpu.memory_space<vmem>>, vector<1x128xf32>
    %c0_27 = arith.constant 0 : index
    %c0_28 = arith.constant 0 : index
    %20 = vector.load %arg12[%c0_27, %c0_28] : memref<32x32xf32, #tpu.memory_space<vmem>>, vector<32x32xf32>
    %c0_29 = arith.constant 0 : index
    %c0_30 = arith.constant 0 : index
    %21 = vector.load %arg13[%c0_29, %c0_30] : memref<1x32xf32, #tpu.memory_space<vmem>>, vector<1x32xf32>
    %c0_31 = arith.constant 0 : index
    %c0_32 = arith.constant 0 : index
    %22 = vector.load %arg14[%c0_31, %c0_32] : memref<32x32xf32, #tpu.memory_space<vmem>>, vector<32x32xf32>
    %c0_33 = arith.constant 0 : index
    %c0_34 = arith.constant 0 : index
    %23 = vector.load %arg15[%c0_33, %c0_34] : memref<1x32xf32, #tpu.memory_space<vmem>>, vector<1x32xf32>
    %c0_35 = arith.constant 0 : index
    %c0_36 = arith.constant 0 : index
    %24 = vector.load %arg16[%c0_35, %c0_36] : memref<32x128xf32, #tpu.memory_space<vmem>>, vector<32x128xf32>
    %c0_37 = arith.constant 0 : index
    %c0_38 = arith.constant 0 : index
    %25 = vector.load %arg17[%c0_37, %c0_38] : memref<1x128xf32, #tpu.memory_space<vmem>>, vector<1x128xf32>
    %c0_39 = arith.constant 0 : index
    %c0_40 = arith.constant 0 : index
    %26 = vector.load %arg18[%c0_39, %c0_40] : memref<1x128xf32, #tpu.memory_space<vmem>>, vector<1x128xf32>
    %cst_41 = arith.constant 3.200000e+01 : f32
    %27 = math.sqrt %cst_41 : f32
    %cst_42 = arith.constant 1.000000e+00 : f32
    %28 = arith.divf %cst_42, %27 : f32
    %29 = arith.addf %15, %13 : vector<8x32xf32>
    %cst_43 = arith.constant dense<0.000000e+00> : vector<8x64xf32>
    %30 = tpu.matmul %29, %10, %cst_43 {dimension_numbers = #tpu.dot_dimension_numbers<[1], [0], [0], [1], [0, 0, 1, 1], [], []>} : vector<8x32xf32>, vector<32x64xf32>, vector<8x64xf32> -> vector<8x64xf32>
    %31 = vector.broadcast %28 : f32 to vector<8x64xf32>
    %32 = arith.mulf %30, %31 : vector<8x64xf32>
    %33 = vector.broadcast %12 : vector<1x64xf32> to vector<8x64xf32>
    %34 = arith.addf %32, %33 : vector<8x64xf32>
    %cst_44 = arith.constant dense<0xFF800000> : vector<8xf32>
    %35 = vector.multi_reduction <maximumf>, %34, %cst_44 [1] : vector<8x64xf32> to vector<8xf32>
    %36 = vector.shape_cast %35 : vector<8xf32> to vector<8x1xf32>
    %37 = vector.broadcast %36 : vector<8x1xf32> to vector<8x64xf32>
    %38 = arith.subf %34, %37 : vector<8x64xf32>
    %39 = math.exp %38 : vector<8x64xf32>
    %cst_45 = arith.constant dense<0.000000e+00> : vector<8xf32>
    %40 = vector.multi_reduction <add>, %39, %cst_45 [1] : vector<8x64xf32> to vector<8xf32>
    %41 = vector.shape_cast %40 : vector<8xf32> to vector<8x1xf32>
    %42 = tpu.reciprocal %41 {approx = true} : vector<8x1xf32> -> vector<8x1xf32>
    %43 = vector.broadcast %42 : vector<8x1xf32> to vector<8x64xf32>
    %44 = arith.mulf %39, %43 : vector<8x64xf32>
    %cst_46 = arith.constant dense<0.000000e+00> : vector<8x32xf32>
    %45 = tpu.matmul %44, %9, %cst_46 {dimension_numbers = #tpu.dot_dimension_numbers<[1], [0], [0], [1], [0, 0, 1, 1], [], []>} : vector<8x64xf32>, vector<64x32xf32>, vector<8x32xf32> -> vector<8x32xf32>
    %46 = vector.extract_strided_slice %16 {offsets = [0, 0, 0], sizes = [1, 32, 32], strides = [1, 1, 1]} : vector<3x32x32xf32> to vector<1x32x32xf32>
    %47 = vector.shape_cast %46 : vector<1x32x32xf32> to vector<32x32xf32>
    %cst_47 = arith.constant dense<0.000000e+00> : vector<8x32xf32>
    %48 = tpu.matmul %45, %47, %cst_47 {dimension_numbers = #tpu.dot_dimension_numbers<[1], [0], [0], [1], [0, 0, 1, 1], [], []>} : vector<8x32xf32>, vector<32x32xf32>, vector<8x32xf32> -> vector<8x32xf32>
    %49 = arith.addf %15, %48 : vector<8x32xf32>
    %50 = vector.extract_strided_slice %17 {offsets = [0, 0, 0], sizes = [1, 1, 32], strides = [1, 1, 1]} : vector<3x1x32xf32> to vector<1x1x32xf32>
    %51 = vector.shape_cast %50 : vector<1x1x32xf32> to vector<1x32xf32>
    %52 = vector.broadcast %51 : vector<1x32xf32> to vector<8x32xf32>
    %53 = arith.addf %49, %52 : vector<8x32xf32>
    %54 = math.tanh %53 : vector<8x32xf32>
    %cst_48 = arith.constant dense<0.000000e+00> : vector<8x128xf32>
    %55 = tpu.matmul %54, %18, %cst_48 {dimension_numbers = #tpu.dot_dimension_numbers<[1], [0], [0], [1], [0, 0, 1, 1], [], []>} : vector<8x32xf32>, vector<32x128xf32>, vector<8x128xf32> -> vector<8x128xf32>
    %56 = vector.broadcast %19 : vector<1x128xf32> to vector<8x128xf32>
    %57 = arith.addf %55, %56 : vector<8x128xf32>
    %cst_49 = arith.constant dense<0.000000e+00> : vector<8x32xf32>
    %58 = tpu.matmul %54, %20, %cst_49 {dimension_numbers = #tpu.dot_dimension_numbers<[1], [0], [0], [1], [0, 0, 1, 1], [], []>} : vector<8x32xf32>, vector<32x32xf32>, vector<8x32xf32> -> vector<8x32xf32>
    %59 = vector.broadcast %21 : vector<1x32xf32> to vector<8x32xf32>
    %60 = arith.addf %58, %59 : vector<8x32xf32>
    %cst_50 = arith.constant 0.000000e+00 : f32
    %61 = vector.broadcast %cst_50 : f32 to vector<8x32xf32>
    %62 = arith.maximumf %60, %61 : vector<8x32xf32>
    %cst_51 = arith.constant dense<0.000000e+00> : vector<8x32xf32>
    %63 = tpu.matmul %62, %22, %cst_51 {dimension_numbers = #tpu.dot_dimension_numbers<[1], [0], [0], [1], [0, 0, 1, 1], [], []>} : vector<8x32xf32>, vector<32x32xf32>, vector<8x32xf32> -> vector<8x32xf32>
    %64 = vector.broadcast %23 : vector<1x32xf32> to vector<8x32xf32>
    %65 = arith.addf %63, %64 : vector<8x32xf32>
    %cst_52 = arith.constant 0.000000e+00 : f32
    %66 = vector.broadcast %cst_52 : f32 to vector<8x32xf32>
    %67 = arith.maximumf %65, %66 : vector<8x32xf32>
    %cst_53 = arith.constant dense<0.000000e+00> : vector<8x128xf32>
    %68 = tpu.matmul %67, %24, %cst_53 {dimension_numbers = #tpu.dot_dimension_numbers<[1], [0], [0], [1], [0, 0, 1, 1], [], []>} : vector<8x32xf32>, vector<32x128xf32>, vector<8x128xf32> -> vector<8x128xf32>
    %69 = vector.broadcast %25 : vector<1x128xf32> to vector<8x128xf32>
    %70 = arith.addf %68, %69 : vector<8x128xf32>
    %71 = arith.negf %70 : vector<8x128xf32>
    %72 = math.exp %71 : vector<8x128xf32>
    %cst_54 = arith.constant 1.000000e+00 : f32
    %73 = vector.broadcast %cst_54 : f32 to vector<8x128xf32>
    %74 = arith.addf %73, %72 : vector<8x128xf32>
    %75 = arith.divf %73, %74 : vector<8x128xf32>
    %76 = vector.broadcast %26 : vector<1x128xf32> to vector<8x128xf32>
    %77 = arith.mulf %76, %75 : vector<8x128xf32>
    %78 = arith.addf %57, %77 : vector<8x128xf32>
    %79 = vector.shape_cast %78 : vector<8x128xf32> to vector<1x8x128xf32>
    %c0_55 = arith.constant 0 : index
    %c0_56 = arith.constant 0 : index
    %c0_57 = arith.constant 0 : index
    %c0_58 = arith.constant 0 : index
    %80 = vector.load %arg19[%c0_55, %c0_56, %c0_57, %c0_58] : memref<3x1x8x128xf32, #tpu.memory_space<vmem>>, vector<1x1x8x128xf32>
    %81 = vector.shape_cast %80 : vector<1x1x8x128xf32> to vector<1x8x128xf32>
    %82 = vector.shape_cast %79 : vector<1x8x128xf32> to vector<1x1x8x128xf32>
    tpu.vector_store %arg19[%c0_55, %c0_56, %c0_57, %c0_58], %82 {strides = array<i32>} : memref<3x1x8x128xf32, #tpu.memory_space<vmem>>, vector<1x1x8x128xf32>,
    %83 = arith.addf %54, %13 : vector<8x32xf32>
    %cst_59 = arith.constant dense<0.000000e+00> : vector<8x64xf32>
    %84 = tpu.matmul %83, %10, %cst_59 {dimension_numbers = #tpu.dot_dimension_numbers<[1], [0], [0], [1], [0, 0, 1, 1], [], []>} : vector<8x32xf32>, vector<32x64xf32>, vector<8x64xf32> -> vector<8x64xf32>
    %85 = vector.broadcast %28 : f32 to vector<8x64xf32>
    %86 = arith.mulf %84, %85 : vector<8x64xf32>
    %87 = vector.broadcast %12 : vector<1x64xf32> to vector<8x64xf32>
    %88 = arith.addf %86, %87 : vector<8x64xf32>
    %cst_60 = arith.constant dense<0xFF800000> : vector<8xf32>
    %89 = vector.multi_reduction <maximumf>, %88, %cst_60 [1] : vector<8x64xf32> to vector<8xf32>
    %90 = vector.shape_cast %89 : vector<8xf32> to vector<8x1xf32>
    %91 = vector.broadcast %90 : vector<8x1xf32> to vector<8x64xf32>
    %92 = arith.subf %88, %91 : vector<8x64xf32>
    %93 = math.exp %92 : vector<8x64xf32>
    %cst_61 = arith.constant dense<0.000000e+00> : vector<8xf32>
    %94 = vector.multi_reduction <add>, %93, %cst_61 [1] : vector<8x64xf32> to vector<8xf32>
    %95 = vector.shape_cast %94 : vector<8xf32> to vector<8x1xf32>
    %96 = tpu.reciprocal %95 {approx = true} : vector<8x1xf32> -> vector<8x1xf32>
    %97 = vector.broadcast %96 : vector<8x1xf32> to vector<8x64xf32>
    %98 = arith.mulf %93, %97 : vector<8x64xf32>
    %cst_62 = arith.constant dense<0.000000e+00> : vector<8x32xf32>
    %99 = tpu.matmul %98, %9, %cst_62 {dimension_numbers = #tpu.dot_dimension_numbers<[1], [0], [0], [1], [0, 0, 1, 1], [], []>} : vector<8x64xf32>, vector<64x32xf32>, vector<8x32xf32> -> vector<8x32xf32>
    %100 = vector.extract_strided_slice %16 {offsets = [1, 0, 0], sizes = [1, 32, 32], strides = [1, 1, 1]} : vector<3x32x32xf32> to vector<1x32x32xf32>
    %101 = vector.shape_cast %100 : vector<1x32x32xf32> to vector<32x32xf32>
    %cst_63 = arith.constant dense<0.000000e+00> : vector<8x32xf32>
    %102 = tpu.matmul %99, %101, %cst_63 {dimension_numbers = #tpu.dot_dimension_numbers<[1], [0], [0], [1], [0, 0, 1, 1], [], []>} : vector<8x32xf32>, vector<32x32xf32>, vector<8x32xf32> -> vector<8x32xf32>
    %103 = arith.addf %54, %102 : vector<8x32xf32>
    %104 = vector.extract_strided_slice %17 {offsets = [1, 0, 0], sizes = [1, 1, 32], strides = [1, 1, 1]} : vector<3x1x32xf32> to vector<1x1x32xf32>
    %105 = vector.shape_cast %104 : vector<1x1x32xf32> to vector<1x32xf32>
    %106 = vector.broadcast %105 : vector<1x32xf32> to vector<8x32xf32>
    %107 = arith.addf %103, %106 : vector<8x32xf32>
    %108 = math.tanh %107 : vector<8x32xf32>
    %cst_64 = arith.constant dense<0.000000e+00> : vector<8x128xf32>
    %109 = tpu.matmul %108, %18, %cst_64 {dimension_numbers = #tpu.dot_dimension_numbers<[1], [0], [0], [1], [0, 0, 1, 1], [], []>} : vector<8x32xf32>, vector<32x128xf32>, vector<8x128xf32> -> vector<8x128xf32>
    %110 = vector.broadcast %19 : vector<1x128xf32> to vector<8x128xf32>
    %111 = arith.addf %109, %110 : vector<8x128xf32>
    %cst_65 = arith.constant dense<0.000000e+00> : vector<8x32xf32>
    %112 = tpu.matmul %108, %20, %cst_65 {dimension_numbers = #tpu.dot_dimension_numbers<[1], [0], [0], [1], [0, 0, 1, 1], [], []>} : vector<8x32xf32>, vector<32x32xf32>, vector<8x32xf32> -> vector<8x32xf32>
    %113 = vector.broadcast %21 : vector<1x32xf32> to vector<8x32xf32>
    %114 = arith.addf %112, %113 : vector<8x32xf32>
    %cst_66 = arith.constant 0.000000e+00 : f32
    %115 = vector.broadcast %cst_66 : f32 to vector<8x32xf32>
    %116 = arith.maximumf %114, %115 : vector<8x32xf32>
    %cst_67 = arith.constant dense<0.000000e+00> : vector<8x32xf32>
    %117 = tpu.matmul %116, %22, %cst_67 {dimension_numbers = #tpu.dot_dimension_numbers<[1], [0], [0], [1], [0, 0, 1, 1], [], []>} : vector<8x32xf32>, vector<32x32xf32>, vector<8x32xf32> -> vector<8x32xf32>
    %118 = vector.broadcast %23 : vector<1x32xf32> to vector<8x32xf32>
    %119 = arith.addf %117, %118 : vector<8x32xf32>
    %cst_68 = arith.constant 0.000000e+00 : f32
    %120 = vector.broadcast %cst_68 : f32 to vector<8x32xf32>
    %121 = arith.maximumf %119, %120 : vector<8x32xf32>
    %cst_69 = arith.constant dense<0.000000e+00> : vector<8x128xf32>
    %122 = tpu.matmul %121, %24, %cst_69 {dimension_numbers = #tpu.dot_dimension_numbers<[1], [0], [0], [1], [0, 0, 1, 1], [], []>} : vector<8x32xf32>, vector<32x128xf32>, vector<8x128xf32> -> vector<8x128xf32>
    %123 = vector.broadcast %25 : vector<1x128xf32> to vector<8x128xf32>
    %124 = arith.addf %122, %123 : vector<8x128xf32>
    %125 = arith.negf %124 : vector<8x128xf32>
    %126 = math.exp %125 : vector<8x128xf32>
    %cst_70 = arith.constant 1.000000e+00 : f32
    %127 = vector.broadcast %cst_70 : f32 to vector<8x128xf32>
    %128 = arith.addf %127, %126 : vector<8x128xf32>
    %129 = arith.divf %127, %128 : vector<8x128xf32>
    %130 = vector.broadcast %26 : vector<1x128xf32> to vector<8x128xf32>
    %131 = arith.mulf %130, %129 : vector<8x128xf32>
    %132 = arith.addf %111, %131 : vector<8x128xf32>
    %133 = vector.shape_cast %132 : vector<8x128xf32> to vector<1x8x128xf32>
    %c1 = arith.constant 1 : index
    %c0_71 = arith.constant 0 : index
    %c0_72 = arith.constant 0 : index
    %c0_73 = arith.constant 0 : index
    %134 = vector.load %arg19[%c1, %c0_71, %c0_72, %c0_73] : memref<3x1x8x128xf32, #tpu.memory_space<vmem>>, vector<1x1x8x128xf32>
    %135 = vector.shape_cast %134 : vector<1x1x8x128xf32> to vector<1x8x128xf32>
    %136 = vector.shape_cast %133 : vector<1x8x128xf32> to vector<1x1x8x128xf32>
    tpu.vector_store %arg19[%c1, %c0_71, %c0_72, %c0_73], %136 {strides = array<i32>} : memref<3x1x8x128xf32, #tpu.memory_space<vmem>>, vector<1x1x8x128xf32>,
    %137 = arith.addf %108, %13 : vector<8x32xf32>
    %cst_74 = arith.constant dense<0.000000e+00> : vector<8x64xf32>
    %138 = tpu.matmul %137, %10, %cst_74 {dimension_numbers = #tpu.dot_dimension_numbers<[1], [0], [0], [1], [0, 0, 1, 1], [], []>} : vector<8x32xf32>, vector<32x64xf32>, vector<8x64xf32> -> vector<8x64xf32>
    %139 = vector.broadcast %28 : f32 to vector<8x64xf32>
    %140 = arith.mulf %138, %139 : vector<8x64xf32>
    %141 = vector.broadcast %12 : vector<1x64xf32> to vector<8x64xf32>
    %142 = arith.addf %140, %141 : vector<8x64xf32>
    %cst_75 = arith.constant dense<0xFF800000> : vector<8xf32>
    %143 = vector.multi_reduction <maximumf>, %142, %cst_75 [1] : vector<8x64xf32> to vector<8xf32>
    %144 = vector.shape_cast %143 : vector<8xf32> to vector<8x1xf32>
    %145 = vector.broadcast %144 : vector<8x1xf32> to vector<8x64xf32>
    %146 = arith.subf %142, %145 : vector<8x64xf32>
    %147 = math.exp %146 : vector<8x64xf32>
    %cst_76 = arith.constant dense<0.000000e+00> : vector<8xf32>
    %148 = vector.multi_reduction <add>, %147, %cst_76 [1] : vector<8x64xf32> to vector<8xf32>
    %149 = vector.shape_cast %148 : vector<8xf32> to vector<8x1xf32>
    %150 = tpu.reciprocal %149 {approx = true} : vector<8x1xf32> -> vector<8x1xf32>
    %151 = vector.broadcast %150 : vector<8x1xf32> to vector<8x64xf32>
    %152 = arith.mulf %147, %151 : vector<8x64xf32>
    %cst_77 = arith.constant dense<0.000000e+00> : vector<8x32xf32>
    %153 = tpu.matmul %152, %9, %cst_77 {dimension_numbers = #tpu.dot_dimension_numbers<[1], [0], [0], [1], [0, 0, 1, 1], [], []>} : vector<8x64xf32>, vector<64x32xf32>, vector<8x32xf32> -> vector<8x32xf32>
    %154 = vector.extract_strided_slice %16 {offsets = [2, 0, 0], sizes = [1, 32, 32], strides = [1, 1, 1]} : vector<3x32x32xf32> to vector<1x32x32xf32>
    %155 = vector.shape_cast %154 : vector<1x32x32xf32> to vector<32x32xf32>
    %cst_78 = arith.constant dense<0.000000e+00> : vector<8x32xf32>
    %156 = tpu.matmul %153, %155, %cst_78 {dimension_numbers = #tpu.dot_dimension_numbers<[1], [0], [0], [1], [0, 0, 1, 1], [], []>} : vector<8x32xf32>, vector<32x32xf32>, vector<8x32xf32> -> vector<8x32xf32>
    %157 = arith.addf %108, %156 : vector<8x32xf32>
    %158 = vector.extract_strided_slice %17 {offsets = [2, 0, 0], sizes = [1, 1, 32], strides = [1, 1, 1]} : vector<3x1x32xf32> to vector<1x1x32xf32>
    %159 = vector.shape_cast %158 : vector<1x1x32xf32> to vector<1x32xf32>
    %160 = vector.broadcast %159 : vector<1x32xf32> to vector<8x32xf32>
    %161 = arith.addf %157, %160 : vector<8x32xf32>
    %162 = math.tanh %161 : vector<8x32xf32>
    %cst_79 = arith.constant dense<0.000000e+00> : vector<8x128xf32>
    %163 = tpu.matmul %162, %18, %cst_79 {dimension_numbers = #tpu.dot_dimension_numbers<[1], [0], [0], [1], [0, 0, 1, 1], [], []>} : vector<8x32xf32>, vector<32x128xf32>, vector<8x128xf32> -> vector<8x128xf32>
    %164 = vector.broadcast %19 : vector<1x128xf32> to vector<8x128xf32>
    %165 = arith.addf %163, %164 : vector<8x128xf32>
    %cst_80 = arith.constant dense<0.000000e+00> : vector<8x32xf32>
    %166 = tpu.matmul %162, %20, %cst_80 {dimension_numbers = #tpu.dot_dimension_numbers<[1], [0], [0], [1], [0, 0, 1, 1], [], []>} : vector<8x32xf32>, vector<32x32xf32>, vector<8x32xf32> -> vector<8x32xf32>
    %167 = vector.broadcast %21 : vector<1x32xf32> to vector<8x32xf32>
    %168 = arith.addf %166, %167 : vector<8x32xf32>
    %cst_81 = arith.constant 0.000000e+00 : f32
    %169 = vector.broadcast %cst_81 : f32 to vector<8x32xf32>
    %170 = arith.maximumf %168, %169 : vector<8x32xf32>
    %cst_82 = arith.constant dense<0.000000e+00> : vector<8x32xf32>
    %171 = tpu.matmul %170, %22, %cst_82 {dimension_numbers = #tpu.dot_dimension_numbers<[1], [0], [0], [1], [0, 0, 1, 1], [], []>} : vector<8x32xf32>, vector<32x32xf32>, vector<8x32xf32> -> vector<8x32xf32>
    %172 = vector.broadcast %23 : vector<1x32xf32> to vector<8x32xf32>
    %173 = arith.addf %171, %172 : vector<8x32xf32>
    %cst_83 = arith.constant 0.000000e+00 : f32
    %174 = vector.broadcast %cst_83 : f32 to vector<8x32xf32>
    %175 = arith.maximumf %173, %174 : vector<8x32xf32>
    %cst_84 = arith.constant dense<0.000000e+00> : vector<8x128xf32>
    %176 = tpu.matmul %175, %24, %cst_84 {dimension_numbers = #tpu.dot_dimension_numbers<[1], [0], [0], [1], [0, 0, 1, 1], [], []>} : vector<8x32xf32>, vector<32x128xf32>, vector<8x128xf32> -> vector<8x128xf32>
    %177 = vector.broadcast %25 : vector<1x128xf32> to vector<8x128xf32>
    %178 = arith.addf %176, %177 : vector<8x128xf32>
    %179 = arith.negf %178 : vector<8x128xf32>
    %180 = math.exp %179 : vector<8x128xf32>
    %cst_85 = arith.constant 1.000000e+00 : f32
    %181 = vector.broadcast %cst_85 : f32 to vector<8x128xf32>
    %182 = arith.addf %181, %180 : vector<8x128xf32>
    %183 = arith.divf %181, %182 : vector<8x128xf32>
    %184 = vector.broadcast %26 : vector<1x128xf32> to vector<8x128xf32>
    %185 = arith.mulf %184, %183 : vector<8x128xf32>
    %186 = arith.addf %165, %185 : vector<8x128xf32>
    %187 = vector.shape_cast %186 : vector<8x128xf32> to vector<1x8x128xf32>
    %c2 = arith.constant 2 : index
    %c0_86 = arith.constant 0 : index
    %c0_87 = arith.constant 0 : index
    %c0_88 = arith.constant 0 : index
    %188 = vector.load %arg19[%c2, %c0_86, %c0_87, %c0_88] : memref<3x1x8x128xf32, #tpu.memory_space<vmem>>, vector<1x1x8x128xf32>
    %189 = vector.shape_cast %188 : vector<1x1x8x128xf32> to vector<1x8x128xf32>
    %190 = vector.shape_cast %187 : vector<1x8x128xf32> to vector<1x1x8x128xf32>
    tpu.vector_store %arg19[%c2, %c0_86, %c0_87, %c0_88], %190 {strides = array<i32>} : memref<3x1x8x128xf32, #tpu.memory_space<vmem>>, vector<1x1x8x128xf32>,
    %c0_89 = arith.constant 0 : index
    %c0_90 = arith.constant 0 : index
    %c0_91 = arith.constant 0 : index
    %191 = vector.load %arg20[%c0_89, %c0_90, %c0_91] : memref<1x8x32xf32, #tpu.memory_space<vmem>>, vector<1x8x32xf32>
    %192 = vector.shape_cast %191 : vector<1x8x32xf32> to vector<8x32xf32>
    %193 = vector.shape_cast %162 : vector<8x32xf32> to vector<1x8x32xf32>
    tpu.vector_store %arg20[%c0_89, %c0_90, %c0_91], %193 {strides = array<i32>} : memref<1x8x32xf32, #tpu.memory_space<vmem>>, vector<1x8x32xf32>,
    return
  }
  func.func @transform_0(%arg0: i32) -> (i32, i32, i32) {
    %c0_i32 = arith.constant 0 : i32
    %c0_i32_0 = arith.constant 0 : i32
    %c0_i32_1 = arith.constant 0 : i32
    return %arg0, %c0_i32, %c0_i32_0 : i32, i32, i32
  }
  func.func @transform_1(%arg0: i32) -> (i32, i32, i32) {
    %c0_i32 = arith.constant 0 : i32
    %c0_i32_0 = arith.constant 0 : i32
    %c0_i32_1 = arith.constant 0 : i32
    return %arg0, %c0_i32, %c0_i32_0 : i32, i32, i32
  }
  func.func @transform_2(%arg0: i32) -> (i32, i32, i32) {
    %c0_i32 = arith.constant 0 : i32
    %c0_i32_0 = arith.constant 0 : i32
    %c0_i32_1 = arith.constant 0 : i32
    return %arg0, %c0_i32, %c0_i32_0 : i32, i32, i32
  }
  func.func @transform_3(%arg0: i32) -> (i32, i32) {
    %c0_i32 = arith.constant 0 : i32
    %c0_i32_0 = arith.constant 0 : i32
    %c0_i32_1 = arith.constant 0 : i32
    return %c0_i32, %c0_i32_0 : i32, i32
  }
  func.func @transform_4(%arg0: i32) -> (i32, i32, i32) {
    %c0_i32 = arith.constant 0 : i32
    %c0_i32_0 = arith.constant 0 : i32
    %c0_i32_1 = arith.constant 0 : i32
    return %arg0, %c0_i32, %c0_i32_0 : i32, i32, i32
  }
  func.func @transform_5(%arg0: i32) -> (i32, i32) {
    %c0_i32 = arith.constant 0 : i32
    %c0_i32_0 = arith.constant 0 : i32
    %c0_i32_1 = arith.constant 0 : i32
    return %c0_i32, %c0_i32_0 : i32, i32
  }
  func.func @transform_6(%arg0: i32) -> (i32, i32) {
    %c0_i32 = arith.constant 0 : i32
    %c0_i32_0 = arith.constant 0 : i32
    %c0_i32_1 = arith.constant 0 : i32
    return %c0_i32, %c0_i32_0 : i32, i32
  }
  func.func @transform_7(%arg0: i32) -> (i32, i32, i32) {
    %c0_i32 = arith.constant 0 : i32
    %c0_i32_0 = arith.constant 0 : i32
    %c0_i32_1 = arith.constant 0 : i32
    %c0_i32_2 = arith.constant 0 : i32
    return %c0_i32, %c0_i32_0, %c0_i32_1 : i32, i32, i32
  }
  func.func @transform_8(%arg0: i32) -> (i32, i32, i32) {
    %c0_i32 = arith.constant 0 : i32
    %c0_i32_0 = arith.constant 0 : i32
    %c0_i32_1 = arith.constant 0 : i32
    %c0_i32_2 = arith.constant 0 : i32
    return %c0_i32, %c0_i32_0, %c0_i32_1 : i32, i32, i32
  }
  func.func @transform_9(%arg0: i32) -> (i32, i32) {
    %c0_i32 = arith.constant 0 : i32
    %c0_i32_0 = arith.constant 0 : i32
    %c0_i32_1 = arith.constant 0 : i32
    return %c0_i32, %c0_i32_0 : i32, i32
  }
  func.func @transform_10(%arg0: i32) -> (i32, i32) {
    %c0_i32 = arith.constant 0 : i32
    %c0_i32_0 = arith.constant 0 : i32
    %c0_i32_1 = arith.constant 0 : i32
    return %c0_i32, %c0_i32_0 : i32, i32
  }
  func.func @transform_11(%arg0: i32) -> (i32, i32) {
    %c0_i32 = arith.constant 0 : i32
    %c0_i32_0 = arith.constant 0 : i32
    %c0_i32_1 = arith.constant 0 : i32
    return %c0_i32, %c0_i32_0 : i32, i32
  }
  func.func @transform_12(%arg0: i32) -> (i32, i32) {
    %c0_i32 = arith.constant 0 : i32
    %c0_i32_0 = arith.constant 0 : i32
    %c0_i32_1 = arith.constant 0 : i32
    return %c0_i32, %c0_i32_0 : i32, i32
  }
  func.func @transform_13(%arg0: i32) -> (i32, i32) {
    %c0_i32 = arith.constant 0 : i32
    %c0_i32_0 = arith.constant 0 : i32
    %c0_i32_1 = arith.constant 0 : i32
    return %c0_i32, %c0_i32_0 : i32, i32
  }
  func.func @transform_14(%arg0: i32) -> (i32, i32) {
    %c0_i32 = arith.constant 0 : i32
    %c0_i32_0 = arith.constant 0 : i32
    %c0_i32_1 = arith.constant 0 : i32
    return %c0_i32, %c0_i32_0 : i32, i32
  }
  func.func @transform_15(%arg0: i32) -> (i32, i32) {
    %c0_i32 = arith.constant 0 : i32
    %c0_i32_0 = arith.constant 0 : i32
    %c0_i32_1 = arith.constant 0 : i32
    return %c0_i32, %c0_i32_0 : i32, i32
  }
  func.func @transform_16(%arg0: i32) -> (i32, i32) {
    %c0_i32 = arith.constant 0 : i32
    %c0_i32_0 = arith.constant 0 : i32
    %c0_i32_1 = arith.constant 0 : i32
    return %c0_i32, %c0_i32_0 : i32, i32
  }
  func.func @transform_17(%arg0: i32) -> (i32, i32) {
    %c0_i32 = arith.constant 0 : i32
    %c0_i32_0 = arith.constant 0 : i32
    %c0_i32_1 = arith.constant 0 : i32
    return %c0_i32, %c0_i32_0 : i32, i32
  }
  func.func @transform_18(%arg0: i32) -> (i32, i32, i32, i32) {
    %c0_i32 = arith.constant 0 : i32
    %c0_i32_0 = arith.constant 0 : i32
    %c0_i32_1 = arith.constant 0 : i32
    %c0_i32_2 = arith.constant 0 : i32
    return %c0_i32, %arg0, %c0_i32_0, %c0_i32_1 : i32, i32, i32, i32
  }
  func.func @transform_19(%arg0: i32) -> (i32, i32, i32) {
    %c0_i32 = arith.constant 0 : i32
    %c0_i32_0 = arith.constant 0 : i32
    %c0_i32_1 = arith.constant 0 : i32
    return %arg0, %c0_i32, %c0_i32_0 : i32, i32, i32
  }
}

</mosaic_0001>

<bundles_post_ra>
// kernel: sin.3
= control target key start
LH: loop header
LB: loop body
LE: loop exit
PB: predicated region body
PF: predicated region fallthrough
CT: control target
= control target key end

     0   :  { %v169_v12 = vmov 683565275   ;;  %v170_v14 = vmov 2475754826   ;;  %v171_v16 = vmov 2131351028   ;;  %s238_s0 = inlined_call_operand.vmem [shape: f32[8,1,8], index: 0, kind: input, shape index: {}]   ;;  %s239_s1 = inlined_call_operand.vmem [shape: f32[8,1,8], index: 1, kind: output, shape index: {}]  }
   0x1   :  { %v189_v0 = vld [vmem:[%s238_s0] sm:$0xff]  ;;  %v172_v18 = vmov 2102212464   ;;  %v173_v20 = vmov 920167782  }
   0x2   :  { %v6_v1 = vand.u32 2139095040, %v189_v0  ;;  %v3_v3 = vand.u32 2147483647, %v189_v0  ;;  %v174_v26 = vmov 1326507024   ;;  %vm5_vm12 = vcmp.lt.s32.totalorder %v189_v0, 0 }
   0x4   :  { %v7_v2 = vshrl.u32 %v6_v1, 23  ;;  %v10_v6 = vand.u32 8388607, %v3_v3  ;;  %v175_v1 = vmov 0   ;;  %vm4_vm13 = vcmp.le.f32.partialorder %v3_v3, 0.7853982 }
   0x6   :  { %v159_v4 = vadd.s32 4294967169, %v7_v2  ;;  %v11_v9 = vor.u32 8388608, %v10_v6 }
   0x8   :  { %v13_v5 = vadd.s32 1, %v159_v4  ;;  %v198_v28 = vshll.u32 %v11_v9, 8 }
   0xa   :  { %vm14_vm0 = vcmp.gt.s32.totalorder %v13_v5, 0  ;;  %v52_v40 = vand.u32 65535, %v198_v28  ;;  %v53_v41 = vshrl.u32 %v198_v28, 16 }
   0xb   :  { %v15_v7 = vsel %vm14_vm0, %v13_v5, 0 }
   0xc   :  { %v17_v8 = vand.u32 31, %v15_v7  ;;  %v195_v10 = vshrl.u32 %v15_v7, 5 }
   0xe   :  { %v18_v11 = vsub.s32 32, %v17_v8  ;;  %v20_v13 = vshll.u32 %v169_v12, %v17_v8  ;;  %v23_v15 = vshll.u32 %v170_v14, %v17_v8  ;;  %v26_v17 = vshll.u32 %v171_v16, %v17_v8 }
   0xf   :  { %v29_v19 = vshll.u32 %v172_v18, %v17_v8  ;;  %v32_v21 = vshll.u32 %v173_v20, %v17_v8  ;;  %vm35_vm1 = vcmp.lt.s32.totalorder %v195_v10, 1  ;;  %vm38_vm2 = vcmp.lt.s32.totalorder %v195_v10, 4 }
  0x10   :  { %v21_v22 = vshrl.u32 %v170_v14, %v18_v11  ;;  %v24_v23 = vshrl.u32 %v171_v16, %v18_v11  ;;  %v27_v24 = vshrl.u32 %v172_v18, %v18_v11  ;;  %v30_v25 = vshrl.u32 %v173_v20, %v18_v11 }
  0x11   :  { %v33_v27 = vshrl.u32 %v174_v26, %v18_v11  ;;  %vm37_vm3 = vcmp.lt.s32.totalorder %v195_v10, 3  ;;  %vm36_vm4 = vcmp.lt.s32.totalorder %v195_v10, 2  ;;  %v19_v48 = vshrl.u32 %v169_v12, %v18_v11 }
  0x12   :  { %v22_v29 = vor.u32 %v21_v22, %v20_v13  ;;  %v25_v30 = vor.u32 %v24_v23, %v23_v15  ;;  %v28_v31 = vor.u32 %v27_v24, %v26_v17  ;;  %v31_v32 = vor.u32 %v30_v25, %v29_v19 }
  0x13   :  { %v34_v33 = vor.u32 %v33_v27, %v32_v21 }
  0x14   :  { %v43_v34 = vsel %vm35_vm1, %v22_v29, %v25_v30  ;;  %v47_v35 = vsel %vm35_vm1, %v25_v30, %v28_v31  ;;  %v44_v36 = vsel %vm38_vm2, %v31_v32, 920167782  ;;  %v39_v61 = vsel %vm35_vm1, %v19_v48, %v22_v29 }
  0x15   :  { %v48_v37 = vsel %vm38_vm2, %v34_v33, 1326507024  ;;  %v45_v38 = vsel %vm37_vm3, %v28_v31, %v44_v36  ;;  %v40_v63 = vsel %vm38_vm2, %v28_v31, 2102212464  ;;  %vm146_vm1 = vweird.f32 %v189_v0 }
  0x16   :  { %v49_v39 = vsel %vm37_vm3, %v31_v32, %v48_v37  ;;  %v46_v42 = vsel %vm36_vm4, %v43_v34, %v45_v38  ;;  %v41_v12 = vsel %vm37_vm3, %v25_v30, %v40_v63 }
  0x17   :  { %v50_v43 = vsel %vm36_vm4, %v47_v35, %v49_v39  ;;  %v76_v46 = vand.u32 65535, %v46_v42  ;;  %v77_v47 = vshrl.u32 %v46_v42, 16  ;;  %v42_v10 = vsel %vm36_vm4, %v39_v61, %v41_v12 }
  0x18   :  { %v54_v44 = vand.u32 65535, %v50_v43  ;;  %v55_v45 = vshrl.u32 %v50_v43, 16  ;;  %v96_v23 = vmul.u32 %v198_v28, %v42_v10 }
  0x19   :  { %v78_v52 = vmul.u32 %v76_v46, %v52_v40  ;;  %v79_v53 = vmul.u32 %v77_v47, %v52_v40  ;;  %v80_v54 = vmul.u32 %v76_v46, %v53_v41  ;;  %v81_v58 = vmul.u32 %v77_v47, %v53_v41 }
  0x1a   :  { %v56_v49 = vmul.u32 %v54_v44, %v52_v40  ;;  %v57_v50 = vmul.u32 %v55_v45, %v52_v40  ;;  %v58_v51 = vmul.u32 %v54_v44, %v53_v41  ;;  %v59_v55 = vmul.u32 %v55_v45, %v53_v41 }
  0x1b   :  { %v82_v59 = vshll.u32 %v79_v53, 16  ;;  %v84_v60 = vshll.u32 %v80_v54, 16  ;;  %v83_v9 = vshrl.u32 %v79_v53, 16  ;;  %v85_v16 = vshrl.u32 %v80_v54, 16 }
  0x1c   :  { %v60_v56 = vshll.u32 %v57_v50, 16  ;;  %v62_v57 = vshll.u32 %v58_v51, 16  ;;  %v61_v5 = vshrl.u32 %v57_v50, 16  ;;  %v63_v13 = vshrl.u32 %v58_v51, 16 }
  0x1d   :  { %vm86_vm6 = vc.u32 %v78_v52, %v82_v59  ;;  %v88_v4 = vadd.s32 %v82_v59, %v78_v52 }
  0x1e   :  { %vm64_vm5 = vc.u32 %v56_v49, %v60_v56  ;;  %v66_v62 = vadd.s32 %v60_v56, %v56_v49  ;;  %v87_v7 = vsel %vm86_vm6, 1, %v175_v1 }
  0x1f   :  { %v65_v2 = vsel %vm64_vm5, 1, %v175_v1  ;;  %v89_v11 = vadd.s32 %v87_v7, %v81_v58  ;;  %vm90_vm8 = vc.u32 %v88_v4, %v84_v60  ;;  %v92_v19 = vadd.s32 %v88_v4, %v84_v60 }
  0x20   :  { %v67_v6 = vadd.s32 %v65_v2, %v59_v55  ;;  %vm68_vm7 = vc.u32 %v66_v62, %v62_v57  ;;  %v91_v15 = vsel %vm90_vm8, 1, %v175_v1 }
  0x21   :  { %v69_v8 = vsel %vm68_vm7, 1, %v175_v1  ;;  %v93_v17 = vadd.s32 %v91_v15, %v89_v11 }
  0x22   :  { %v71_v14 = vadd.s32 %v69_v8, %v67_v6 }
  0x23   :  { %v94_v20 = vadd.s32 %v93_v17, %v83_v9 }
  0x24   :  { %v72_v18 = vadd.s32 %v71_v14, %v61_v5 }
  0x25   :  { %v95_v22 = vadd.s32 %v94_v20, %v85_v16 }
  0x26   :  { %v73_v21 = vadd.s32 %v72_v18, %v63_v13 }
  0x27   :  { %v99_v24 = vadd.s32 1, %v95_v22 }
  0x28   :  { %vm98_vm9 = vc.u32 %v73_v21, %v92_v19  ;;  %v97_v35 = vadd.s32 %v92_v19, %v73_v21 }
  0x29   :  { %v100_v25 = vsel %vm98_vm9, %v99_v24, %v95_v22 }
  0x2a   :  { %v101_v26 = vadd.s32 %v100_v25, %v96_v23 }
  0x2c   :  { %v102_v27 = vadd.s32 536870912, %v101_v26 }
  0x2e   :  { %v103_v28 = vshrl.u32 %v102_v27, 30 }
  0x30   :  { %v104_v29 = vshll.u32 %v103_v28, 30  ;;  %v127_v48 = vsub.s32 4, %v103_v28 }
  0x32   :  { %v105_v30 = vsub.s32 %v101_v26, %v104_v29  ;;  %v128_v50 = vsel %vm5_vm12, %v127_v48, %v103_v28 }
  0x33   :  { %v130_v53 = vsel %vm4_vm13, 0, %v128_v50 }
  0x34   :  { %vm106_vm10 = vcmp.lt.s32.totalorder %v105_v30, 0  ;;  %v107_v31 = vsub.s32 0, %v105_v30  ;;  %v147_v58 = vadd.s32 3, %v130_v53 }
  0x36   :  { %v108_v32 = vsel %vm106_vm10, %v107_v31, %v105_v30  ;;  %v148_v63 = vand.u32 3, %v147_v58 }
  0x37   :  { %v109_v33 = vclz %v108_v32 }
  0x38   :  { %vm153_vm14 = vcmp.eq.s32.totalorder %v148_v63, 2  ;;  %vm150_vm15 = vcmp.eq.s32.totalorder %v148_v63, 0  ;;  %vm149_vm0 = vcmp.lt.s32.totalorder %v148_v63, 2 }
  0x39   :  { %v160_v34 = vadd.s32 4294967294, %v109_v33 }
  0x3b   :  { %vm161_vm11 = vcmp.lt.s32.totalorder %v160_v34, 0 }
  0x3c   :  { %v112_v36 = vsel %vm161_vm11, 0, %v160_v34 }
  0x3d   :  { %v113_v37 = vsub.s32 32, %v112_v36  ;;  %v114_v38 = vshll.u32 %v105_v30, %v112_v36  ;;  %v117_v39 = vsub.s32 4294967266, %v112_v36 }
  0x3f   :  { %v115_v40 = vshrl.u32 %v97_v35, %v113_v37  ;;  %v118_v41 = vadd.s32 127, %v117_v39 }
  0x41   :  { %v116_v42 = vor.u32 %v115_v40, %v114_v38  ;;  %v119_v43 = vshll.u32 %v118_v41, 23 }
  0x43   :  { %v120_v44 = vor.u32 4788187, %v119_v43  ;;  %v123_v45 = vcvt.s32.f32 %v116_v42 }
  0x45   :  { %v121_v46 = vand.u32 2147483647, %v120_v44 }
  0x47   :  { %v124_v47 = vmul.f32 %v123_v45, %v121_v46 }
  0x49   :  { %v125_v3 = vxor.u32 2147483648, %v124_v47 }
  0x4b   :  { %v126_v49 = vsel %vm5_vm12, %v125_v3, %v124_v47 }
  0x4c   :  { %v129_v51 = vsel %vm4_vm13, %v189_v0, %v126_v49 }
  0x4d   :  { %v131_v52 = vmul.f32 %v129_v51, %v129_v51 }
  0x4f   :  { %v132_v54 = vmul.f32 -0.001358992, %v131_v52  ;;  %v139_v55 = vmul.f32 -0.00019511016, %v131_v52 }
  0x51   :  { %v133_v56 = vadd.f32 0.041655596, %v132_v54  ;;  %v140_v57 = vadd.f32 0.008332121, %v139_v55 }
  0x53   :  { %v134_v59 = vmul.f32 %v133_v56, %v131_v52  ;;  %v141_v60 = vmul.f32 %v140_v57, %v131_v52 }
  0x55   :  { %v135_v61 = vadd.f32 -0.4999988, %v134_v59  ;;  %v142_v62 = vadd.f32 -0.16666654, %v141_v60 }
  0x57   :  { %v136_v1 = vmul.f32 %v135_v61, %v131_v52  ;;  %v143_v2 = vmul.f32 %v142_v62, %v131_v52 }
  0x59   :  { %v137_v4 = vadd.f32 1.0, %v136_v1  ;;  %v144_v5 = vadd.f32 1.0, %v143_v2 }
  0x5b   :  { %v145_v6 = vmul.f32 %v144_v5, %v129_v51  ;;  %v154_v7 = vxor.u32 2147483648, %v137_v4 }
  0x5d   :  { %v151_v8 = vxor.u32 2147483648, %v145_v6  ;;  %v155_v9 = vsel %vm153_vm14, %v154_v7, %v145_v6 }
  0x5f   :  { %v152_v0 = vsel %vm150_vm15, %v137_v4, %v151_v8 }
  0x60   :  { %v156_v11 = vsel %vm149_vm0, %v152_v0, %v155_v9 }
  0x61   :  { %v157_v12 = vsel %vm146_vm1, nan, %v156_v11 }
  0x62   :  { %158 = vst [vmem:[%s239_s1] sm:$0xff] %v157_v12 }

// kernel: cos.3
= control target key start
LH: loop header
LB: loop body
LE: loop exit
PB: predicated region body
PF: predicated region fallthrough
CT: control target
= control target key end

     0   :  { %v168_v12 = vmov 683565275   ;;  %v169_v14 = vmov 2475754826   ;;  %v170_v16 = vmov 2131351028   ;;  %s245_s0 = inlined_call_operand.vmem [shape: f32[8,1,8], index: 0, kind: input, shape index: {}]   ;;  %s246_s1 = inlined_call_operand.vmem [shape: f32[8,1,8], index: 1, kind: output, shape index: {}]  }
   0x1   :  { %v188_v0 = vld [vmem:[%s245_s0] sm:$0xff]  ;;  %v171_v18 = vmov 2102212464   ;;  %v172_v20 = vmov 920167782  }
   0x2   :  { %v6_v1 = vand.u32 2139095040, %v188_v0  ;;  %v3_v3 = vand.u32 2147483647, %v188_v0  ;;  %v173_v26 = vmov 1326507024   ;;  %vm5_vm12 = vcmp.lt.s32.totalorder %v188_v0, 0 }
   0x4   :  { %v7_v2 = vshrl.u32 %v6_v1, 23  ;;  %v10_v6 = vand.u32 8388607, %v3_v3  ;;  %v174_v1 = vmov 0   ;;  %vm232_vm13 = vcmp.le.f32.partialorder %v3_v3, 0.7853982 }
   0x6   :  { %v158_v4 = vadd.s32 4294967169, %v7_v2  ;;  %v11_v9 = vor.u32 8388608, %v10_v6 }
   0x8   :  { %v13_v5 = vadd.s32 1, %v158_v4  ;;  %v197_v28 = vshll.u32 %v11_v9, 8 }
   0xa   :  { %vm14_vm0 = vcmp.gt.s32.totalorder %v13_v5, 0  ;;  %v52_v40 = vand.u32 65535, %v197_v28  ;;  %v53_v41 = vshrl.u32 %v197_v28, 16 }
   0xb   :  { %v15_v7 = vsel %vm14_vm0, %v13_v5, 0 }
   0xc   :  { %v17_v8 = vand.u32 31, %v15_v7  ;;  %v194_v10 = vshrl.u32 %v15_v7, 5 }
   0xe   :  { %v18_v11 = vsub.s32 32, %v17_v8  ;;  %v20_v13 = vshll.u32 %v168_v12, %v17_v8  ;;  %v23_v15 = vshll.u32 %v169_v14, %v17_v8  ;;  %v26_v17 = vshll.u32 %v170_v16, %v17_v8 }
   0xf   :  { %v29_v19 = vshll.u32 %v171_v18, %v17_v8  ;;  %v32_v21 = vshll.u32 %v172_v20, %v17_v8  ;;  %vm35_vm1 = vcmp.lt.s32.totalorder %v194_v10, 1  ;;  %vm38_vm2 = vcmp.lt.s32.totalorder %v194_v10, 4 }
  0x10   :  { %v21_v22 = vshrl.u32 %v169_v14, %v18_v11  ;;  %v24_v23 = vshrl.u32 %v170_v16, %v18_v11  ;;  %v27_v24 = vshrl.u32 %v171_v18, %v18_v11  ;;  %v30_v25 = vshrl.u32 %v172_v20, %v18_v11 }
  0x11   :  { %v33_v27 = vshrl.u32 %v173_v26, %v18_v11  ;;  %vm37_vm3 = vcmp.lt.s32.totalorder %v194_v10, 3  ;;  %vm36_vm4 = vcmp.lt.s32.totalorder %v194_v10, 2  ;;  %v19_v48 = vshrl.u32 %v168_v12, %v18_v11 }
  0x12   :  { %v22_v29 = vor.u32 %v21_v22, %v20_v13  ;;  %v25_v30 = vor.u32 %v24_v23, %v23_v15  ;;  %v28_v31 = vor.u32 %v27_v24, %v26_v17  ;;  %v31_v32 = vor.u32 %v30_v25, %v29_v19 }
  0x13   :  { %v34_v33 = vor.u32 %v33_v27, %v32_v21 }
  0x14   :  { %v43_v34 = vsel %vm35_vm1, %v22_v29, %v25_v30  ;;  %v47_v35 = vsel %vm35_vm1, %v25_v30, %v28_v31  ;;  %v44_v36 = vsel %vm38_vm2, %v31_v32, 920167782  ;;  %v39_v61 = vsel %vm35_vm1, %v19_v48, %v22_v29 }
  0x15   :  { %v48_v37 = vsel %vm38_vm2, %v34_v33, 1326507024  ;;  %v45_v38 = vsel %vm37_vm3, %v28_v31, %v44_v36  ;;  %v40_v63 = vsel %vm38_vm2, %v28_v31, 2102212464  ;;  %vm146_vm1 = vweird.f32 %v188_v0 }
  0x16   :  { %v49_v39 = vsel %vm37_vm3, %v31_v32, %v48_v37  ;;  %v46_v42 = vsel %vm36_vm4, %v43_v34, %v45_v38  ;;  %v41_v12 = vsel %vm37_vm3, %v25_v30, %v40_v63 }
  0x17   :  { %v50_v43 = vsel %vm36_vm4, %v47_v35, %v49_v39  ;;  %v76_v46 = vand.u32 65535, %v46_v42  ;;  %v77_v47 = vshrl.u32 %v46_v42, 16  ;;  %v42_v10 = vsel %vm36_vm4, %v39_v61, %v41_v12 }
  0x18   :  { %v54_v44 = vand.u32 65535, %v50_v43  ;;  %v55_v45 = vshrl.u32 %v50_v43, 16  ;;  %v96_v23 = vmul.u32 %v197_v28, %v42_v10 }
  0x19   :  { %v78_v52 = vmul.u32 %v76_v46, %v52_v40  ;;  %v79_v53 = vmul.u32 %v77_v47, %v52_v40  ;;  %v80_v54 = vmul.u32 %v76_v46, %v53_v41  ;;  %v81_v58 = vmul.u32 %v77_v47, %v53_v41 }
  0x1a   :  { %v56_v49 = vmul.u32 %v54_v44, %v52_v40  ;;  %v57_v50 = vmul.u32 %v55_v45, %v52_v40  ;;  %v58_v51 = vmul.u32 %v54_v44, %v53_v41  ;;  %v59_v55 = vmul.u32 %v55_v45, %v53_v41 }
  0x1b   :  { %v82_v59 = vshll.u32 %v79_v53, 16  ;;  %v84_v60 = vshll.u32 %v80_v54, 16  ;;  %v83_v9 = vshrl.u32 %v79_v53, 16  ;;  %v85_v16 = vshrl.u32 %v80_v54, 16 }
  0x1c   :  { %v60_v56 = vshll.u32 %v57_v50, 16  ;;  %v62_v57 = vshll.u32 %v58_v51, 16  ;;  %v61_v5 = vshrl.u32 %v57_v50, 16  ;;  %v63_v13 = vshrl.u32 %v58_v51, 16 }
  0x1d   :  { %vm86_vm6 = vc.u32 %v78_v52, %v82_v59  ;;  %v88_v4 = vadd.s32 %v82_v59, %v78_v52 }
  0x1e   :  { %vm64_vm5 = vc.u32 %v56_v49, %v60_v56  ;;  %v66_v62 = vadd.s32 %v60_v56, %v56_v49  ;;  %v87_v7 = vsel %vm86_vm6, 1, %v174_v1 }
  0x1f   :  { %v65_v2 = vsel %vm64_vm5, 1, %v174_v1  ;;  %v89_v11 = vadd.s32 %v87_v7, %v81_v58  ;;  %vm90_vm8 = vc.u32 %v88_v4, %v84_v60  ;;  %v92_v19 = vadd.s32 %v88_v4, %v84_v60 }
  0x20   :  { %v67_v6 = vadd.s32 %v65_v2, %v59_v55  ;;  %vm68_vm7 = vc.u32 %v66_v62, %v62_v57  ;;  %v91_v15 = vsel %vm90_vm8, 1, %v174_v1 }
  0x21   :  { %v69_v8 = vsel %vm68_vm7, 1, %v174_v1  ;;  %v93_v17 = vadd.s32 %v91_v15, %v89_v11 }
  0x22   :  { %v71_v14 = vadd.s32 %v69_v8, %v67_v6 }
  0x23   :  { %v94_v20 = vadd.s32 %v93_v17, %v83_v9 }
  0x24   :  { %v72_v18 = vadd.s32 %v71_v14, %v61_v5 }
  0x25   :  { %v95_v22 = vadd.s32 %v94_v20, %v85_v16 }
  0x26   :  { %v73_v21 = vadd.s32 %v72_v18, %v63_v13 }
  0x27   :  { %v99_v24 = vadd.s32 1, %v95_v22 }
  0x28   :  { %vm98_vm9 = vc.u32 %v73_v21, %v92_v19  ;;  %v97_v35 = vadd.s32 %v92_v19, %v73_v21 }
  0x29   :  { %v100_v25 = vsel %vm98_vm9, %v99_v24, %v95_v22 }
  0x2a   :  { %v101_v26 = vadd.s32 %v100_v25, %v96_v23 }
  0x2c   :  { %v102_v27 = vadd.s32 536870912, %v101_v26 }
  0x2e   :  { %v103_v28 = vshrl.u32 %v102_v27, 30 }
  0x30   :  { %v104_v29 = vshll.u32 %v103_v28, 30  ;;  %v127_v50 = vsub.s32 4, %v103_v28 }
  0x32   :  { %v105_v30 = vsub.s32 %v101_v26, %v104_v29  ;;  %v128_v55 = vsel %vm5_vm12, %v127_v50, %v103_v28 }
  0x33   :  { %v130_v58 = vsel %vm232_vm13, 0, %v128_v55 }
  0x34   :  { %vm106_vm10 = vcmp.lt.s32.totalorder %v105_v30, 0  ;;  %v107_v31 = vsub.s32 0, %v105_v30  ;;  %v147_v63 = vand.u32 3, %v130_v58 }
  0x36   :  { %v108_v32 = vsel %vm106_vm10, %v107_v31, %v105_v30  ;;  %vm152_vm14 = vcmp.eq.s32.totalorder %v147_v63, 2  ;;  %vm149_vm15 = vcmp.eq.s32.totalorder %v147_v63, 0  ;;  %vm148_vm0 = vcmp.lt.s32.totalorder %v147_v63, 2 }
  0x37   :  { %v109_v33 = vclz %v108_v32 }
  0x39   :  { %v159_v34 = vadd.s32 4294967294, %v109_v33 }
  0x3b   :  { %vm160_vm11 = vcmp.lt.s32.totalorder %v159_v34, 0 }
  0x3c   :  { %v112_v36 = vsel %vm160_vm11, 0, %v159_v34 }
  0x3d   :  { %v113_v37 = vsub.s32 32, %v112_v36  ;;  %v114_v38 = vshll.u32 %v105_v30, %v112_v36  ;;  %v117_v39 = vsub.s32 4294967266, %v112_v36 }
  0x3f   :  { %v115_v40 = vshrl.u32 %v97_v35, %v113_v37  ;;  %v118_v41 = vadd.s32 127, %v117_v39 }
  0x41   :  { %v116_v42 = vor.u32 %v115_v40, %v114_v38  ;;  %v119_v43 = vshll.u32 %v118_v41, 23 }
  0x43   :  { %v120_v44 = vor.u32 4788187, %v119_v43  ;;  %v123_v45 = vcvt.s32.f32 %v116_v42 }
  0x45   :  { %v121_v46 = vand.u32 2147483647, %v120_v44 }
  0x47   :  { %v124_v47 = vmul.f32 %v123_v45, %v121_v46 }
  0x49   :  { %v125_v48 = vxor.u32 2147483648, %v124_v47 }
  0x4b   :  { %v126_v49 = vsel %vm5_vm12, %v125_v48, %v124_v47 }
  0x4c   :  { %v129_v51 = vsel %vm232_vm13, %v188_v0, %v126_v49 }
  0x4d   :  { %v131_v52 = vmul.f32 %v129_v51, %v129_v51 }
  0x4f   :  { %v132_v53 = vmul.f32 -0.001358992, %v131_v52  ;;  %v139_v54 = vmul.f32 -0.00019511016, %v131_v52 }
  0x51   :  { %v133_v56 = vadd.f32 0.041655596, %v132_v53  ;;  %v140_v57 = vadd.f32 0.008332121, %v139_v54 }
  0x53   :  { %v134_v59 = vmul.f32 %v133_v56, %v131_v52  ;;  %v141_v60 = vmul.f32 %v140_v57, %v131_v52 }
  0x55   :  { %v135_v61 = vadd.f32 -0.4999988, %v134_v59  ;;  %v142_v62 = vadd.f32 -0.16666654, %v141_v60 }
  0x57   :  { %v136_v1 = vmul.f32 %v135_v61, %v131_v52  ;;  %v143_v2 = vmul.f32 %v142_v62, %v131_v52 }
  0x59   :  { %v137_v4 = vadd.f32 1.0, %v136_v1  ;;  %v144_v5 = vadd.f32 1.0, %v143_v2 }
  0x5b   :  { %v145_v6 = vmul.f32 %v144_v5, %v129_v51  ;;  %v153_v7 = vxor.u32 2147483648, %v137_v4 }
  0x5d   :  { %v150_v8 = vxor.u32 2147483648, %v145_v6  ;;  %v154_v9 = vsel %vm152_vm14, %v153_v7, %v145_v6 }
  0x5f   :  { %v151_v0 = vsel %vm149_vm15, %v137_v4, %v150_v8 }
  0x60   :  { %v155_v11 = vsel %vm148_vm0, %v151_v0, %v154_v9 }
  0x61   :  { %v156_v12 = vsel %vm146_vm1, nan, %v155_v11 }
  0x62   :  { %157 = vst [vmem:[%s246_s1] sm:$0xff] %v156_v12 }

// kernel: sin.2
= control target key start
LH: loop header
LB: loop body
LE: loop exit
PB: predicated region body
PF: predicated region fallthrough
CT: control target
= control target key end

     0   :  { %v169_v12 = vmov 683565275   ;;  %v170_v14 = vmov 2475754826   ;;  %v171_v16 = vmov 2131351028   ;;  %s238_s0 = inlined_call_operand.vmem [shape: f32[1,8,8], index: 0, kind: input, shape index: {}]   ;;  %s239_s1 = inlined_call_operand.vmem [shape: f32[1,8,8], index: 1, kind: output, shape index: {}]  }
   0x1   :  { %v189_v0 = vld [vmem:[%s238_s0] sm:$0xff]  ;;  %v172_v18 = vmov 2102212464   ;;  %v173_v20 = vmov 920167782  }
   0x2   :  { %v6_v1 = vand.u32 2139095040, %v189_v0  ;;  %v3_v3 = vand.u32 2147483647, %v189_v0  ;;  %v174_v26 = vmov 1326507024   ;;  %vm5_vm12 = vcmp.lt.s32.totalorder %v189_v0, 0 }
   0x4   :  { %v7_v2 = vshrl.u32 %v6_v1, 23  ;;  %v10_v6 = vand.u32 8388607, %v3_v3  ;;  %v175_v1 = vmov 0   ;;  %vm4_vm13 = vcmp.le.f32.partialorder %v3_v3, 0.7853982 }
   0x6   :  { %v159_v4 = vadd.s32 4294967169, %v7_v2  ;;  %v11_v9 = vor.u32 8388608, %v10_v6 }
   0x8   :  { %v13_v5 = vadd.s32 1, %v159_v4  ;;  %v198_v28 = vshll.u32 %v11_v9, 8 }
   0xa   :  { %vm14_vm0 = vcmp.gt.s32.totalorder %v13_v5, 0  ;;  %v52_v40 = vand.u32 65535, %v198_v28  ;;  %v53_v41 = vshrl.u32 %v198_v28, 16 }
   0xb   :  { %v15_v7 = vsel %vm14_vm0, %v13_v5, 0 }
   0xc   :  { %v17_v8 = vand.u32 31, %v15_v7  ;;  %v195_v10 = vshrl.u32 %v15_v7, 5 }
   0xe   :  { %v18_v11 = vsub.s32 32, %v17_v8  ;;  %v20_v13 = vshll.u32 %v169_v12, %v17_v8  ;;  %v23_v15 = vshll.u32 %v170_v14, %v17_v8  ;;  %v26_v17 = vshll.u32 %v171_v16, %v17_v8 }
   0xf   :  { %v29_v19 = vshll.u32 %v172_v18, %v17_v8  ;;  %v32_v21 = vshll.u32 %v173_v20, %v17_v8  ;;  %vm35_vm1 = vcmp.lt.s32.totalorder %v195_v10, 1  ;;  %vm38_vm2 = vcmp.lt.s32.totalorder %v195_v10, 4 }
  0x10   :  { %v21_v22 = vshrl.u32 %v170_v14, %v18_v11  ;;  %v24_v23 = vshrl.u32 %v171_v16, %v18_v11  ;;  %v27_v24 = vshrl.u32 %v172_v18, %v18_v11  ;;  %v30_v25 = vshrl.u32 %v173_v20, %v18_v11 }
  0x11   :  { %v33_v27 = vshrl.u32 %v174_v26, %v18_v11  ;;  %vm37_vm3 = vcmp.lt.s32.totalorder %v195_v10, 3  ;;  %vm36_vm4 = vcmp.lt.s32.totalorder %v195_v10, 2  ;;  %v19_v48 = vshrl.u32 %v169_v12, %v18_v11 }
  0x12   :  { %v22_v29 = vor.u32 %v21_v22, %v20_v13  ;;  %v25_v30 = vor.u32 %v24_v23, %v23_v15  ;;  %v28_v31 = vor.u32 %v27_v24, %v26_v17  ;;  %v31_v32 = vor.u32 %v30_v25, %v29_v19 }
  0x13   :  { %v34_v33 = vor.u32 %v33_v27, %v32_v21 }
  0x14   :  { %v43_v34 = vsel %vm35_vm1, %v22_v29, %v25_v30  ;;  %v47_v35 = vsel %vm35_vm1, %v25_v30, %v28_v31  ;;  %v44_v36 = vsel %vm38_vm2, %v31_v32, 920167782  ;;  %v39_v61 = vsel %vm35_vm1, %v19_v48, %v22_v29 }
  0x15   :  { %v48_v37 = vsel %vm38_vm2, %v34_v33, 1326507024  ;;  %v45_v38 = vsel %vm37_vm3, %v28_v31, %v44_v36  ;;  %v40_v63 = vsel %vm38_vm2, %v28_v31, 2102212464  ;;  %vm146_vm1 = vweird.f32 %v189_v0 }
  0x16   :  { %v49_v39 = vsel %vm37_vm3, %v31_v32, %v48_v37  ;;  %v46_v42 = vsel %vm36_vm4, %v43_v34, %v45_v38  ;;  %v41_v12 = vsel %vm37_vm3, %v25_v30, %v40_v63 }
  0x17   :  { %v50_v43 = vsel %vm36_vm4, %v47_v35, %v49_v39  ;;  %v76_v46 = vand.u32 65535, %v46_v42  ;;  %v77_v47 = vshrl.u32 %v46_v42, 16  ;;  %v42_v10 = vsel %vm36_vm4, %v39_v61, %v41_v12 }
  0x18   :  { %v54_v44 = vand.u32 65535, %v50_v43  ;;  %v55_v45 = vshrl.u32 %v50_v43, 16  ;;  %v96_v23 = vmul.u32 %v198_v28, %v42_v10 }
  0x19   :  { %v78_v52 = vmul.u32 %v76_v46, %v52_v40  ;;  %v79_v53 = vmul.u32 %v77_v47, %v52_v40  ;;  %v80_v54 = vmul.u32 %v76_v46, %v53_v41  ;;  %v81_v58 = vmul.u32 %v77_v47, %v53_v41 }
  0x1a   :  { %v56_v49 = vmul.u32 %v54_v44, %v52_v40  ;;  %v57_v50 = vmul.u32 %v55_v45, %v52_v40  ;;  %v58_v51 = vmul.u32 %v54_v44, %v53_v41  ;;  %v59_v55 = vmul.u32 %v55_v45, %v53_v41 }
  0x1b   :  { %v82_v59 = vshll.u32 %v79_v53, 16  ;;  %v84_v60 = vshll.u32 %v80_v54, 16  ;;  %v83_v9 = vshrl.u32 %v79_v53, 16  ;;  %v85_v16 = vshrl.u32 %v80_v54, 16 }
  0x1c   :  { %v60_v56 = vshll.u32 %v57_v50, 16  ;;  %v62_v57 = vshll.u32 %v58_v51, 16  ;;  %v61_v5 = vshrl.u32 %v57_v50, 16  ;;  %v63_v13 = vshrl.u32 %v58_v51, 16 }
  0x1d   :  { %vm86_vm6 = vc.u32 %v78_v52, %v82_v59  ;;  %v88_v4 = vadd.s32 %v82_v59, %v78_v52 }
  0x1e   :  { %vm64_vm5 = vc.u32 %v56_v49, %v60_v56  ;;  %v66_v62 = vadd.s32 %v60_v56, %v56_v49  ;;  %v87_v7 = vsel %vm86_vm6, 1, %v175_v1 }
  0x1f   :  { %v65_v2 = vsel %vm64_vm5, 1, %v175_v1  ;;  %v89_v11 = vadd.s32 %v87_v7, %v81_v58  ;;  %vm90_vm8 = vc.u32 %v88_v4, %v84_v60  ;;  %v92_v19 = vadd.s32 %v88_v4, %v84_v60 }
  0x20   :  { %v67_v6 = vadd.s32 %v65_v2, %v59_v55  ;;  %vm68_vm7 = vc.u32 %v66_v62, %v62_v57  ;;  %v91_v15 = vsel %vm90_vm8, 1, %v175_v1 }
  0x21   :  { %v69_v8 = vsel %vm68_vm7, 1, %v175_v1  ;;  %v93_v17 = vadd.s32 %v91_v15, %v89_v11 }
  0x22   :  { %v71_v14 = vadd.s32 %v69_v8, %v67_v6 }
  0x23   :  { %v94_v20 = vadd.s32 %v93_v17, %v83_v9 }
  0x24   :  { %v72_v18 = vadd.s32 %v71_v14, %v61_v5 }
  0x25   :  { %v95_v22 = vadd.s32 %v94_v20, %v85_v16 }
  0x26   :  { %v73_v21 = vadd.s32 %v72_v18, %v63_v13 }
  0x27   :  { %v99_v24 = vadd.s32 1, %v95_v22 }
  0x28   :  { %vm98_vm9 = vc.u32 %v73_v21, %v92_v19  ;;  %v97_v35 = vadd.s32 %v92_v19, %v73_v21 }
  0x29   :  { %v100_v25 = vsel %vm98_vm9, %v99_v24, %v95_v22 }
  0x2a   :  { %v101_v26 = vadd.s32 %v100_v25, %v96_v23 }
  0x2c   :  { %v102_v27 = vadd.s32 536870912, %v101_v26 }
  0x2e   :  { %v103_v28 = vshrl.u32 %v102_v27, 30 }
  0x30   :  { %v104_v29 = vshll.u32 %v103_v28, 30  ;;  %v127_v48 = vsub.s32 4, %v103_v28 }
  0x32   :  { %v105_v30 = vsub.s32 %v101_v26, %v104_v29  ;;  %v128_v50 = vsel %vm5_vm12, %v127_v48, %v103_v28 }
  0x33   :  { %v130_v53 = vsel %vm4_vm13, 0, %v128_v50 }
  0x34   :  { %vm106_vm10 = vcmp.lt.s32.totalorder %v105_v30, 0  ;;  %v107_v31 = vsub.s32 0, %v105_v30  ;;  %v147_v58 = vadd.s32 3, %v130_v53 }
  0x36   :  { %v108_v32 = vsel %vm106_vm10, %v107_v31, %v105_v30  ;;  %v148_v63 = vand.u32 3, %v147_v58 }
  0x37   :  { %v109_v33 = vclz %v108_v32 }
  0x38   :  { %vm153_vm14 = vcmp.eq.s32.totalorder %v148_v63, 2  ;;  %vm150_vm15 = vcmp.eq.s32.totalorder %v148_v63, 0  ;;  %vm149_vm0 = vcmp.lt.s32.totalorder %v148_v63, 2 }
  0x39   :  { %v160_v34 = vadd.s32 4294967294, %v109_v33 }
  0x3b   :  { %vm161_vm11 = vcmp.lt.s32.totalorder %v160_v34, 0 }
  0x3c   :  { %v112_v36 = vsel %vm161_vm11, 0, %v160_v34 }
  0x3d   :  { %v113_v37 = vsub.s32 32, %v112_v36  ;;  %v114_v38 = vshll.u32 %v105_v30, %v112_v36  ;;  %v117_v39 = vsub.s32 4294967266, %v112_v36 }
  0x3f   :  { %v115_v40 = vshrl.u32 %v97_v35, %v113_v37  ;;  %v118_v41 = vadd.s32 127, %v117_v39 }
  0x41   :  { %v116_v42 = vor.u32 %v115_v40, %v114_v38  ;;  %v119_v43 = vshll.u32 %v118_v41, 23 }
  0x43   :  { %v120_v44 = vor.u32 4788187, %v119_v43  ;;  %v123_v45 = vcvt.s32.f32 %v116_v42 }
  0x45   :  { %v121_v46 = vand.u32 2147483647, %v120_v44 }
  0x47   :  { %v124_v47 = vmul.f32 %v123_v45, %v121_v46 }
  0x49   :  { %v125_v3 = vxor.u32 2147483648, %v124_v47 }
  0x4b   :  { %v126_v49 = vsel %vm5_vm12, %v125_v3, %v124_v47 }
  0x4c   :  { %v129_v51 = vsel %vm4_vm13, %v189_v0, %v126_v49 }
  0x4d   :  { %v131_v52 = vmul.f32 %v129_v51, %v129_v51 }
  0x4f   :  { %v132_v54 = vmul.f32 -0.001358992, %v131_v52  ;;  %v139_v55 = vmul.f32 -0.00019511016, %v131_v52 }
  0x51   :  { %v133_v56 = vadd.f32 0.041655596, %v132_v54  ;;  %v140_v57 = vadd.f32 0.008332121, %v139_v55 }
  0x53   :  { %v134_v59 = vmul.f32 %v133_v56, %v131_v52  ;;  %v141_v60 = vmul.f32 %v140_v57, %v131_v52 }
  0x55   :  { %v135_v61 = vadd.f32 -0.4999988, %v134_v59  ;;  %v142_v62 = vadd.f32 -0.16666654, %v141_v60 }
  0x57   :  { %v136_v1 = vmul.f32 %v135_v61, %v131_v52  ;;  %v143_v2 = vmul.f32 %v142_v62, %v131_v52 }
  0x59   :  { %v137_v4 = vadd.f32 1.0, %v136_v1  ;;  %v144_v5 = vadd.f32 1.0, %v143_v2 }
  0x5b   :  { %v145_v6 = vmul.f32 %v144_v5, %v129_v51  ;;  %v154_v7 = vxor.u32 2147483648, %v137_v4 }
  0x5d   :  { %v151_v8 = vxor.u32 2147483648, %v145_v6  ;;  %v155_v9 = vsel %vm153_vm14, %v154_v7, %v145_v6 }
  0x5f   :  { %v152_v0 = vsel %vm150_vm15, %v137_v4, %v151_v8 }
  0x60   :  { %v156_v11 = vsel %vm149_vm0, %v152_v0, %v155_v9 }
  0x61   :  { %v157_v12 = vsel %vm146_vm1, nan, %v156_v11 }
  0x62   :  { %158 = vst [vmem:[%s239_s1] sm:$0xff] %v157_v12 }

// kernel: cos.2
= control target key start
LH: loop header
LB: loop body
LE: loop exit
PB: predicated region body
PF: predicated region fallthrough
CT: control target
= control target key end

     0   :  { %v168_v12 = vmov 683565275   ;;  %v169_v14 = vmov 2475754826   ;;  %v170_v16 = vmov 2131351028   ;;  %s245_s0 = inlined_call_operand.vmem [shape: f32[1,8,8], index: 0, kind: input, shape index: {}]   ;;  %s246_s1 = inlined_call_operand.vmem [shape: f32[1,8,8], index: 1, kind: output, shape index: {}]  }
   0x1   :  { %v188_v0 = vld [vmem:[%s245_s0] sm:$0xff]  ;;  %v171_v18 = vmov 2102212464   ;;  %v172_v20 = vmov 920167782  }
   0x2   :  { %v6_v1 = vand.u32 2139095040, %v188_v0  ;;  %v3_v3 = vand.u32 2147483647, %v188_v0  ;;  %v173_v26 = vmov 1326507024   ;;  %vm5_vm12 = vcmp.lt.s32.totalorder %v188_v0, 0 }
   0x4   :  { %v7_v2 = vshrl.u32 %v6_v1, 23  ;;  %v10_v6 = vand.u32 8388607, %v3_v3  ;;  %v174_v1 = vmov 0   ;;  %vm232_vm13 = vcmp.le.f32.partialorder %v3_v3, 0.7853982 }
   0x6   :  { %v158_v4 = vadd.s32 4294967169, %v7_v2  ;;  %v11_v9 = vor.u32 8388608, %v10_v6 }
   0x8   :  { %v13_v5 = vadd.s32 1, %v158_v4  ;;  %v197_v28 = vshll.u32 %v11_v9, 8 }
   0xa   :  { %vm14_vm0 = vcmp.gt.s32.totalorder %v13_v5, 0  ;;  %v52_v40 = vand.u32 65535, %v197_v28  ;;  %v53_v41 = vshrl.u32 %v197_v28, 16 }
   0xb   :  { %v15_v7 = vsel %vm14_vm0, %v13_v5, 0 }
   0xc   :  { %v17_v8 = vand.u32 31, %v15_v7  ;;  %v194_v10 = vshrl.u32 %v15_v7, 5 }
   0xe   :  { %v18_v11 = vsub.s32 32, %v17_v8  ;;  %v20_v13 = vshll.u32 %v168_v12, %v17_v8  ;;  %v23_v15 = vshll.u32 %v169_v14, %v17_v8  ;;  %v26_v17 = vshll.u32 %v170_v16, %v17_v8 }
   0xf   :  { %v29_v19 = vshll.u32 %v171_v18, %v17_v8  ;;  %v32_v21 = vshll.u32 %v172_v20, %v17_v8  ;;  %vm35_vm1 = vcmp.lt.s32.totalorder %v194_v10, 1  ;;  %vm38_vm2 = vcmp.lt.s32.totalorder %v194_v10, 4 }
  0x10   :  { %v21_v22 = vshrl.u32 %v169_v14, %v18_v11  ;;  %v24_v23 = vshrl.u32 %v170_v16, %v18_v11  ;;  %v27_v24 = vshrl.u32 %v171_v18, %v18_v11  ;;  %v30_v25 = vshrl.u32 %v172_v20, %v18_v11 }
  0x11   :  { %v33_v27 = vshrl.u32 %v173_v26, %v18_v11  ;;  %vm37_vm3 = vcmp.lt.s32.totalorder %v194_v10, 3  ;;  %vm36_vm4 = vcmp.lt.s32.totalorder %v194_v10, 2  ;;  %v19_v48 = vshrl.u32 %v168_v12, %v18_v11 }
  0x12   :  { %v22_v29 = vor.u32 %v21_v22, %v20_v13  ;;  %v25_v30 = vor.u32 %v24_v23, %v23_v15  ;;  %v28_v31 = vor.u32 %v27_v24, %v26_v17  ;;  %v31_v32 = vor.u32 %v30_v25, %v29_v19 }
  0x13   :  { %v34_v33 = vor.u32 %v33_v27, %v32_v21 }
  0x14   :  { %v43_v34 = vsel %vm35_vm1, %v22_v29, %v25_v30  ;;  %v47_v35 = vsel %vm35_vm1, %v25_v30, %v28_v31  ;;  %v44_v36 = vsel %vm38_vm2, %v31_v32, 920167782  ;;  %v39_v61 = vsel %vm35_vm1, %v19_v48, %v22_v29 }
  0x15   :  { %v48_v37 = vsel %vm38_vm2, %v34_v33, 1326507024  ;;  %v45_v38 = vsel %vm37_vm3, %v28_v31, %v44_v36  ;;  %v40_v63 = vsel %vm38_vm2, %v28_v31, 2102212464  ;;  %vm146_vm1 = vweird.f32 %v188_v0 }
  0x16   :  { %v49_v39 = vsel %vm37_vm3, %v31_v32, %v48_v37  ;;  %v46_v42 = vsel %vm36_vm4, %v43_v34, %v45_v38  ;;  %v41_v12 = vsel %vm37_vm3, %v25_v30, %v40_v63 }
  0x17   :  { %v50_v43 = vsel %vm36_vm4, %v47_v35, %v49_v39  ;;  %v76_v46 = vand.u32 65535, %v46_v42  ;;  %v77_v47 = vshrl.u32 %v46_v42, 16  ;;  %v42_v10 = vsel %vm36_vm4, %v39_v61, %v41_v12 }
  0x18   :  { %v54_v44 = vand.u32 65535, %v50_v43  ;;  %v55_v45 = vshrl.u32 %v50_v43, 16  ;;  %v96_v23 = vmul.u32 %v197_v28, %v42_v10 }
  0x19   :  { %v78_v52 = vmul.u32 %v76_v46, %v52_v40  ;;  %v79_v53 = vmul.u32 %v77_v47, %v52_v40  ;;  %v80_v54 = vmul.u32 %v76_v46, %v53_v41  ;;  %v81_v58 = vmul.u32 %v77_v47, %v53_v41 }
  0x1a   :  { %v56_v49 = vmul.u32 %v54_v44, %v52_v40  ;;  %v57_v50 = vmul.u32 %v55_v45, %v52_v40  ;;  %v58_v51 = vmul.u32 %v54_v44, %v53_v41  ;;  %v59_v55 = vmul.u32 %v55_v45, %v53_v41 }
  0x1b   :  { %v82_v59 = vshll.u32 %v79_v53, 16  ;;  %v84_v60 = vshll.u32 %v80_v54, 16  ;;  %v83_v9 = vshrl.u32 %v79_v53, 16  ;;  %v85_v16 = vshrl.u32 %v80_v54, 16 }
  0x1c   :  { %v60_v56 = vshll.u32 %v57_v50, 16  ;;  %v62_v57 = vshll.u32 %v58_v51, 16  ;;  %v61_v5 = vshrl.u32 %v57_v50, 16  ;;  %v63_v13 = vshrl.u32 %v58_v51, 16 }
  0x1d   :  { %vm86_vm6 = vc.u32 %v78_v52, %v82_v59  ;;  %v88_v4 = vadd.s32 %v82_v59, %v78_v52 }
  0x1e   :  { %vm64_vm5 = vc.u32 %v56_v49, %v60_v56  ;;  %v66_v62 = vadd.s32 %v60_v56, %v56_v49  ;;  %v87_v7 = vsel %vm86_vm6, 1, %v174_v1 }
  0x1f   :  { %v65_v2 = vsel %vm64_vm5, 1, %v174_v1  ;;  %v89_v11 = vadd.s32 %v87_v7, %v81_v58  ;;  %vm90_vm8 = vc.u32 %v88_v4, %v84_v60  ;;  %v92_v19 = vadd.s32 %v88_v4, %v84_v60 }
  0x20   :  { %v67_v6 = vadd.s32 %v65_v2, %v59_v55  ;;  %vm68_vm7 = vc.u32 %v66_v62, %v62_v57  ;;  %v91_v15 = vsel %vm90_vm8, 1, %v174_v1 }
  0x21   :  { %v69_v8 = vsel %vm68_vm7, 1, %v174_v1  ;;  %v93_v17 = vadd.s32 %v91_v15, %v89_v11 }
  0x22   :  { %v71_v14 = vadd.s32 %v69_v8, %v67_v6 }
  0x23   :  { %v94_v20 = vadd.s32 %v93_v17, %v83_v9 }
  0x24   :  { %v72_v18 = vadd.s32 %v71_v14, %v61_v5 }
  0x25   :  { %v95_v22 = vadd.s32 %v94_v20, %v85_v16 }
  0x26   :  { %v73_v21 = vadd.s32 %v72_v18, %v63_v13 }
  0x27   :  { %v99_v24 = vadd.s32 1, %v95_v22 }
  0x28   :  { %vm98_vm9 = vc.u32 %v73_v21, %v92_v19  ;;  %v97_v35 = vadd.s32 %v92_v19, %v73_v21 }
  0x29   :  { %v100_v25 = vsel %vm98_vm9, %v99_v24, %v95_v22 }
  0x2a   :  { %v101_v26 = vadd.s32 %v100_v25, %v96_v23 }
  0x2c   :  { %v102_v27 = vadd.s32 536870912, %v101_v26 }
  0x2e   :  { %v103_v28 = vshrl.u32 %v102_v27, 30 }
  0x30   :  { %v104_v29 = vshll.u32 %v103_v28, 30  ;;  %v127_v50 = vsub.s32 4, %v103_v28 }
  0x32   :  { %v105_v30 = vsub.s32 %v101_v26, %v104_v29  ;;  %v128_v55 = vsel %vm5_vm12, %v127_v50, %v103_v28 }
  0x33   :  { %v130_v58 = vsel %vm232_vm13, 0, %v128_v55 }
  0x34   :  { %vm106_vm10 = vcmp.lt.s32.totalorder %v105_v30, 0  ;;  %v107_v31 = vsub.s32 0, %v105_v30  ;;  %v147_v63 = vand.u32 3, %v130_v58 }
  0x36   :  { %v108_v32 = vsel %vm106_vm10, %v107_v31, %v105_v30  ;;  %vm152_vm14 = vcmp.eq.s32.totalorder %v147_v63, 2  ;;  %vm149_vm15 = vcmp.eq.s32.totalorder %v147_v63, 0  ;;  %vm148_vm0 = vcmp.lt.s32.totalorder %v147_v63, 2 }
  0x37   :  { %v109_v33 = vclz %v108_v32 }
  0x39   :  { %v159_v34 = vadd.s32 4294967294, %v109_v33 }
  0x3b   :  { %vm160_vm11 = vcmp.lt.s32.totalorder %v159_v34, 0 }
  0x3c   :  { %v112_v36 = vsel %vm160_vm11, 0, %v159_v34 }
  0x3d   :  { %v113_v37 = vsub.s32 32, %v112_v36  ;;  %v114_v38 = vshll.u32 %v105_v30, %v112_v36  ;;  %v117_v39 = vsub.s32 4294967266, %v112_v36 }
  0x3f   :  { %v115_v40 = vshrl.u32 %v97_v35, %v113_v37  ;;  %v118_v41 = vadd.s32 127, %v117_v39 }
  0x41   :  { %v116_v42 = vor.u32 %v115_v40, %v114_v38  ;;  %v119_v43 = vshll.u32 %v118_v41, 23 }
  0x43   :  { %v120_v44 = vor.u32 4788187, %v119_v43  ;;  %v123_v45 = vcvt.s32.f32 %v116_v42 }
  0x45   :  { %v121_v46 = vand.u32 2147483647, %v120_v44 }
  0x47   :  { %v124_v47 = vmul.f32 %v123_v45, %v121_v46 }
  0x49   :  { %v125_v48 = vxor.u32 2147483648, %v124_v47 }
  0x4b   :  { %v126_v49 = vsel %vm5_vm12, %v125_v48, %v124_v47 }
  0x4c   :  { %v129_v51 = vsel %vm232_vm13, %v188_v0, %v126_v49 }
  0x4d   :  { %v131_v52 = vmul.f32 %v129_v51, %v129_v51 }
  0x4f   :  { %v132_v53 = vmul.f32 -0.001358992, %v131_v52  ;;  %v139_v54 = vmul.f32 -0.00019511016, %v131_v52 }
  0x51   :  { %v133_v56 = vadd.f32 0.041655596, %v132_v53  ;;  %v140_v57 = vadd.f32 0.008332121, %v139_v54 }
  0x53   :  { %v134_v59 = vmul.f32 %v133_v56, %v131_v52  ;;  %v141_v60 = vmul.f32 %v140_v57, %v131_v52 }
  0x55   :  { %v135_v61 = vadd.f32 -0.4999988, %v134_v59  ;;  %v142_v62 = vadd.f32 -0.16666654, %v141_v60 }
  0x57   :  { %v136_v1 = vmul.f32 %v135_v61, %v131_v52  ;;  %v143_v2 = vmul.f32 %v142_v62, %v131_v52 }
  0x59   :  { %v137_v4 = vadd.f32 1.0, %v136_v1  ;;  %v144_v5 = vadd.f32 1.0, %v143_v2 }
  0x5b   :  { %v145_v6 = vmul.f32 %v144_v5, %v129_v51  ;;  %v153_v7 = vxor.u32 2147483648, %v137_v4 }
  0x5d   :  { %v150_v8 = vxor.u32 2147483648, %v145_v6  ;;  %v154_v9 = vsel %vm152_vm14, %v153_v7, %v145_v6 }
  0x5f   :  { %v151_v0 = vsel %vm149_vm15, %v137_v4, %v150_v8 }
  0x60   :  { %v155_v11 = vsel %vm148_vm0, %v151_v0, %v154_v9 }
  0x61   :  { %v156_v12 = vsel %vm146_vm1, nan, %v155_v11 }
  0x62   :  { %157 = vst [vmem:[%s246_s1] sm:$0xff] %v156_v12 }

// kernel: _detrtrack_forward.1
= control target key start
LH: loop header
LB: loop body
LE: loop exit
PB: predicated region body
PF: predicated region fallthrough
CT: control target
= control target key end

     0   :  { %s2462_s0 = inlined_call_operand.vmem [shape: f32[2,64,3], index: 0, kind: input, shape index: {}]   ;;  %s2463_s1 = inlined_call_operand.vmem [shape: f32[2,64,32], index: 1, kind: input, shape index: {}]   ;;  %s2464_s2 = inlined_call_operand.vmem [shape: f32[2,1,64], index: 2, kind: input, shape index: {}]   ;;  %s2465_s3 = inlined_call_operand.vmem [shape: f32[8,32], index: 3, kind: input, shape index: {}]   ;;  %s2466_s4 = inlined_call_operand.vmem [shape: f32[2,8,32], index: 4, kind: input, shape index: {}]   ;;  %s2467_s5 = inlined_call_operand.vmem [shape: f32[3,32], index: 5, kind: input, shape index: {}]   ;;  %s2468_s6 = inlined_call_operand.vmem [shape: f32[1,32], index: 6, kind: input, shape index: {}]   ;;  %s2469_s7 = inlined_call_operand.vmem [shape: f32[3,32,32], index: 7, kind: input, shape index: {}]   ;;  %s2470_s8 = inlined_call_operand.vmem [shape: f32[3,1,32], index: 8, kind: input, shape index: {}]   ;;  %s2471_s9 = inlined_call_operand.vmem [shape: f32[32,128], index: 9, kind: input, shape index: {}]   ;;  %s2472_s10 = inlined_call_operand.vmem [shape: f32[1,128], index: 10, kind: input, shape index: {}]   ;;  %s2473_s11 = inlined_call_operand.vmem [shape: f32[32,32], index: 11, kind: input, shape index: {}]   ;;  %s2474_s12 = inlined_call_operand.vmem [shape: f32[1,32], index: 12, kind: input, shape index: {}]   ;;  %s2475_s13 = inlined_call_operand.vmem [shape: f32[32,32], index: 13, kind: input, shape index: {}]   ;;  %s2476_s14 = inlined_call_operand.vmem [shape: f32[1,32], index: 14, kind: input, shape index: {}]   ;;  %s2477_s15 = inlined_call_operand.vmem [shape: f32[32,128], index: 15, kind: input, shape index: {}]   ;;  %s2478_s16 = inlined_call_operand.vmem [shape: f32[1,128], index: 16, kind: input, shape index: {}]   ;;  %s2479_s17 = inlined_call_operand.vmem [shape: f32[1,128], index: 17, kind: input, shape index: {}]   ;;  %s2480_s18 = inlined_call_operand.vmem [shape: f32[3,2,8,128], index: 18, kind: output, shape index: {0}]   ;;  %s2481_s19 = inlined_call_operand.hbm [shape: f32[2,8,32], index: 19, kind: output, shape index: {1}]  }
   0x1   :  { %2483 = sst [smem:[#allocation8_spill]] %s2462_s0 }
   0x2   :  { %2484 = sst [smem:[#allocation9_spill]] %s2463_s1 }
   0x3   :  { %2485 = sst [smem:[#allocation10_spill]] %s2464_s2 }
   0x4   :  { %2486 = sst [smem:[#allocation11_spill]] %s2465_s3 }
   0x5   :  { %2487 = sst [smem:[#allocation12_spill]] %s2466_s4 }
   0x6   :  { %2488 = sst [smem:[#allocation13_spill]] %s2467_s5 }
   0x7   :  { %2489 = sst [smem:[#allocation14_spill]] %s2468_s6 }
   0x8   :  { %2490 = sst [smem:[#allocation15_spill]] %s2469_s7 }
   0x9   :  { %2491 = sst [smem:[#allocation16_spill]] %s2470_s8 }
   0xa   :  { %2492 = sst [smem:[#allocation17_spill]] %s2471_s9 }
   0xb   :  { %25 = vsyncpa [#allocation4], 0 }
   0xc   :  { %27 = vsyncpa [#allocation4 + $0x1], 0  ;;  %s1956_s0 = smov 0   ;;  %s1958_s30 = smov 0  }
   0xd   :  { %s1960_s20 = smov 0   ;;  %s1962_s21 = smov 0  }
   0xe LB: > { %2493 = sst [smem:[#allocation6_spill]] %s1850_s20  ;;  %s1977_s1 = sadd.s32 4294967295, %s1854_s21   ;;  %s1854_s21 = sphi %s1962_s21, %s2512_s21   ;;  %s1850_s20 = sphi %s1960_s20, %s2509_s20   ;;  %s1846_s30 = sphi %s1958_s30, %s2511_s30   ;;  %s1842_s0 = sphi %s1956_s0, %s2510_s0  }
   0xf   : > { %s1636_s22 = sadd.s32 4294967294, %s1854_s21   ;;  %s1981_s2 = sadd.s32 1, %s1854_s21  }
  0x10   : > { %s438_s23 = sadd.s32 1, %s1850_s20  ;;  %s435_s24 = ssub.s32 %s1854_s21, %s1981_s2 }
  0x11   : > { %p448_p0 = scmp.ne.s32.totalorder %s1850_s20, %s1846_s30  ;;  %p436_p1 = scmp.eq.s32.totalorder %s435_s24, 0 }
  0x12   : > { %p449_p2 = scmp.eq.s32.totalorder %s1977_s1, 1  ;;  %p480_p3 = scmp.ne.s32.totalorder %s1846_s30, %s1842_s0 }
  0x13   : > { %p481_p4 = scmp.eq.s32.totalorder %s1636_s22, 1  ;;  %p1639_p7 = scmp.ge.s32.totalorder %s1854_s21, 1 }
  0x14   : > { %s1992_s25 = scalar_select %p436_p1, %s1850_s20, %s438_s23  }
  0x15   : > { %p1994_p5 = por %p449_p2, %p448_p0  ;;  %p1998_p6 = por %p481_p4, %p480_p3 }
  0x16   : > { %2494 = sst [smem:[#allocation7_spill]] %s1992_s25  ;;  %p570_p8 = scmp.lt.s32.totalorder %s1854_s21, 3 }
  0x18   : > { %p571_p9 = pnand %p1639_p7, %p570_p8 }
  0x19   : > { %s2497_s5 = sld [smem:[#allocation13_spill]] (!%p571_p9)  ;;  %p642_p10 = scmp.lt.s32.totalorder (!%p571_p9), %s1977_s1, 1 }
  0x1a   : > { %574 = sbr.rel (%p571_p9) target bundleno = 2827 (0xb0b), region = 92  ;;  %s2498_s25 = sld [smem:[#allocation8_spill]] (!%p571_p9) }
  0x1b   : > { %s2499_s28 = sld [smem:[#allocation9_spill]] (!%p571_p9) }
  0x1c   : > { %s2500_s6 = sld [smem:[#allocation14_spill]] (!%p571_p9) }
  0x1d   : > { %s2501_s4 = sld [smem:[#allocation12_spill]] (!%p571_p9) }
  0x1e   : > { %s2504_s7 = sld [smem:[#allocation15_spill]] (!%p571_p9) }
  0x1f   : > { %v667_v0 = vld [vmem:[%s2497_s5] sm:$0x7]  ;;  %vm697_vm0 = vcmask 1042432   ;;  %s2009_s29 = scalar_select %p642_p10, %s1977_s1, 1  ;;  %vm672_vm1 = vcmask 23552   ;;  %vm798_vm2 = vcmask 261120  }
  0x20   : > { %1646 = vmatpush.msk.msra.mxu0 %vm697_vm0, %v667_v0  ;;  %vm851_vm3 = vcmask 523264   ;;  %s2505_s9 = sld [smem:[#allocation17_spill]]  ;;  %s1706_s24 = sshll.u32 (%p1994_p5), %s1977_s1, 3 }
  0x21   : > { %s1710_s22 = sshll.u32 %s2009_s29, 6  ;;  %s1645_s5 = sshll.u32 %s2009_s29, 3 }
  0x22   : > { %s646_s20 = scalar_lea.vmem %s2498_s25, %s1710_s22  ;;  %s2026_s23 = scalar_lea.vmem %s2499_s28, %s1710_s22  ;;  %v1752_v9 = vld [vmem:[%s2500_s6] ss:$0 sm:$0xff] }
  0x23   : > { %v659_v1 = vld [vmem:[%s646_s20] sm:$0xff]  ;;  %v660_v2 = vld [vmem:[%s646_s20 + $0x8] sm:$0xff]  ;;  %v661_v3 = vld [vmem:[%s646_s20 + $0x10] sm:$0xff]  ;;  %s658_s25 = scalar_lea.vmem %s2501_s4, %s1645_s5  ;;  %s2506_s8 = sld [smem:[#allocation16_spill]] }
  0x24   : > { %1647 = vmatmul.msk.f32.vlgmr.msra.gmra.mxu0 %vm672_vm1, %v659_v1  ;;  %v662_v4 = vld [vmem:[%s646_s20 + $0x18] sm:$0xff]  ;;  %v663_v5 = vld [vmem:[%s646_s20 + $0x20] sm:$0xff]  ;;  %v664_v6 = vld [vmem:[%s646_s20 + $0x28] sm:$0xff]  ;;  %s1463_s4 = scalar_lea.vmem (%p1994_p5), %s2480_s18, %s1706_s24 }
  0x25   : > { %v665_v7 = vld [vmem:[%s646_s20 + $0x30] sm:$0xff]  ;;  %v666_v8 = vld [vmem:[%s646_s20 + $0x38] sm:$0xff]  ;;  %v742_v11 = vld [vmem:[%s2026_s23] sm:$0xff]  ;;  %s2503_s20 = sld [smem:[#allocation10_spill]] }
  0x26   : > { %v749_v21 = vld [vmem:[%s2026_s23 + $0x38] sm:$0xff]  ;;  %v748_v24 = vld [vmem:[%s2026_s23 + $0x30] sm:$0xff]  ;;  %v747_v27 = vld [vmem:[%s2026_s23 + $0x28] sm:$0xff] }
  0x27   : > { %v746_v30 = vld [vmem:[%s2026_s23 + $0x20] sm:$0xff]  ;;  %v745_v33 = vld [vmem:[%s2026_s23 + $0x18] sm:$0xff]  ;;  %v744_v36 = vld [vmem:[%s2026_s23 + $0x10] sm:$0xff] }
  0x28   : > { %v743_v39 = vld [vmem:[%s2026_s23 + $0x8] sm:$0xff]  ;;  %s2502_s23 = sld [smem:[#allocation11_spill]]  ;;  %v2098_v43 = vld [vmem:[%s658_s25] sm:$0xff]  ;;  %v764_v55 = vld [vmem:[%s2504_s7 + $0x18] sm:$0xff]  ;;  %s2290_s25 = sand.u32 1, %s1846_s30  }
  0x29   : > { %v763_v56 = vld [vmem:[%s2504_s7 + $0x10] sm:$0xff]  ;;  %901 = vmatpush.msra.mxu3 %v764_v55  ;;  %v762_v57 = vld [vmem:[%s2504_s7 + $0x8] sm:$0xff]  ;;  %v761_v61 = vld [vmem:[%s2504_s7] sm:$0xff]  ;;  %s1640_s27 = sshll.u32 %s2290_s25, 3 }
  0x2a   : > { %v2142_v62 = vld [vmem:[%s2505_s9 + $0x18] sm:$0xff]  ;;  %v2149_v0 = vld [vmem:[%s2505_s9 + $0x10] sm:$0xff]  ;;  %v2155_v1 = vld [vmem:[%s2505_s9 + $0x8] sm:$0xff]  ;;  %s2404_s28 = scalar_lea.vmem [#allocation3], %s1640_s27 }
  0x2b   : > { %s654_s22 = scalar_lea.vmem %s2503_s20, %s2009_s29  ;;  %902 = vmatpush.msra.mxu3 %v763_v56 }
  0x2c   : > { %1648 = vmatmul.msk.f32.gmra.mxu0 %vm672_vm1, %v660_v2  ;;  %v2121_v45 = vld [vmem:[%s654_s22] ss:$0 sm:$0xff]  ;;  %s1712_s22 = smul.u32 24, %s2290_s25 }
  0x2d   : > { %903 = vmatpush.msra.mxu3 %v762_v57  ;;  %v2161_v2 = vld [vmem:[%s2505_s9] sm:$0xff] }
  0x2e   : > { %v2096_v42 = vld [vmem:[%s2502_s23] sm:$0xff]  ;;  %s2312_s29 = scalar_lea.vmem [#allocation2], %s1712_s22 }
  0x2f   : > { %v797_v44 = vadd.f32 %v2098_v43, %v2096_v42  ;;  %904 = vmatpush.msra.mxu3 %v761_v61  ;;  %v2302_v61 = vld [vmem:[%s2472_s10] ss:$0 sm:$0xff] }
  0x31   : > { %933 = vmatpush.msrb.mxu3 %v2142_v62 }
  0x33   : > { %934 = vmatpush.msrb.mxu3 %v2149_v0 }
  0x34   : > { %1649 = vmatmul.msk.f32.gmra.mxu0 %vm672_vm1, %v661_v3  ;;  %v2167_v3 = vld [vmem:[%s2473_s11 + $0x18] sm:$0xff] }
  0x35   : > { %935 = vmatpush.msrb.mxu3 %v2155_v1 }
  0x37   : > { %936 = vmatpush.msrb.mxu3 %v2161_v2 }
  0x3c   : > { %1650 = vmatmul.msk.f32.gmra.mxu0 %vm672_vm1, %v662_v4  ;;  %v2172_v4 = vld [vmem:[%s2475_s13 + $0x18] sm:$0xff] }
  0x44   : > { %1651 = vmatmul.msk.f32.gmra.mxu0 %vm672_vm1, %v663_v5  ;;  %v2177_v5 = vld [vmem:[%s2473_s11 + $0x10] sm:$0xff] }
  0x4c   : > { %1652 = vmatmul.msk.f32.gmra.mxu0 %vm672_vm1, %v664_v6  ;;  %v2184_v6 = vld [vmem:[%s2475_s13 + $0x10] sm:$0xff] }
  0x54   : > { %1653 = vmatmul.msk.f32.gmra.mxu0 %vm672_vm1, %v665_v7  ;;  %v2189_v7 = vld [vmem:[%s2473_s11 + $0x8] sm:$0xff] }
  0x5c   : > { %1654 = vmatmul.msk.f32.gmra.mxu0 %vm672_vm1, %v666_v8  ;;  %v2194_v8 = vld [vmem:[%s2475_s13 + $0x8] sm:$0xff] }
  0xa1   : > { %v718_v10 = vpop.f32.mrf.mxu0 }
  0xa2   : > { %v719_v12 = vadd.f32 %v1752_v9, %v718_v10  ;;  %v2208_v10 = vld [vmem:[%s2475_s13] sm:$0xff] }
  0xa4   : > { %v2032_v13 = vadd.f32 %v742_v11, %v719_v12  ;;  %v1754_v11 = vld [vmem:[%s2506_s8] ss:$0 sm:$0xff] }
  0xa9   : > { %v721_v14 = vpop.f32.mrf.mxu0 }
  0xaa   : > { %v722_v37 = vadd.f32 %v1752_v9, %v721_v14 }
  0xac   : > { %v2070_v41 = vadd.f32 %v743_v39, %v722_v37 }
  0xb1   : > { %v724_v15 = vpop.f32.mrf.mxu0 }
  0xb2   : > { %v725_v34 = vadd.f32 %v1752_v9, %v724_v15 }
  0xb4   : > { %v2063_v40 = vadd.f32 %v744_v36, %v725_v34 }
  0xb9   : > { %v727_v16 = vpop.f32.mrf.mxu0 }
  0xba   : > { %v728_v31 = vadd.f32 %v1752_v9, %v727_v16 }
  0xbc   : > { %v2059_v38 = vadd.f32 %v745_v33, %v728_v31 }
  0xc1   : > { %v730_v17 = vpop.f32.mrf.mxu0 }
  0xc2   : > { %v731_v28 = vadd.f32 %v1752_v9, %v730_v17  ;;  %v2249_v17 = vld [vmem:[%s2477_s15 + $0x18] sm:$0xff] }
  0xc4   : > { %v2051_v35 = vadd.f32 %v746_v30, %v731_v28  ;;  %v2283_v28 = vld [vmem:[%s2476_s14] ss:$0 sm:$0xff] }
  0xc9   : > { %v733_v18 = vpop.f32.mrf.mxu0 }
  0xca   : > { %v734_v25 = vadd.f32 %v1752_v9, %v733_v18  ;;  %v2255_v18 = vld [vmem:[%s2474_s12] ss:$0 sm:$0xff] }
  0xcc   : > { %v2047_v32 = vadd.f32 %v747_v27, %v734_v25  ;;  %v2277_v25 = vld [vmem:[%s2477_s15] sm:$0xff] }
  0xd1   : > { %v736_v19 = vpop.f32.mrf.mxu0 }
  0xd2   : > { %v737_v22 = vadd.f32 %v1752_v9, %v736_v19 }
  0xd4   : > { %v2039_v29 = vadd.f32 %v748_v24, %v737_v22  ;;  %v2271_v24 = vld [vmem:[%s2477_s15 + $0x8] sm:$0xff] }
  0xd9   : > { %v739_v20 = vpop.f32.mrf.mxu0 }
  0xda   : > { %v740_v23 = vadd.f32 %v1752_v9, %v739_v20  ;;  %v2203_v9 = vld [vmem:[%s2473_s11] sm:$0xff] }
  0xdc   : > { %v2036_v26 = vadd.f32 %v749_v21, %v740_v23  ;;  %v2265_v23 = vld [vmem:[%s2477_s15 + $0x10] sm:$0xff] }
  0xde   : > { %1655 = vmatpush.xpose.msk.msra.mxu1 %vm798_vm2, %v2036_v26  ;;  %874 = vmatpush.msra.mxu2 %v2036_v26 }
  0xdf   : > { %1688 = vmatpush.xpose.msk.msrb.mxu0 %vm798_vm2, %v2036_v26 }
  0xe0   : > { %875 = vmatpush.msra.mxu2 %v2039_v29 }
  0xe2   : > { %1656 = vmatpush.xpose.msk.msra.mxu1 %vm798_vm2, %v2039_v29  ;;  %876 = vmatpush.msra.mxu2 %v2047_v32 }
  0xe3   : > { %1689 = vmatpush.xpose.msk.msrb.mxu0 %vm798_vm2, %v2039_v29 }
  0xe4   : > { %877 = vmatpush.msra.mxu2 %v2051_v35 }
  0xe6   : > { %1657 = vmatpush.xpose.msk.msra.mxu1 %vm798_vm2, %v2047_v32  ;;  %878 = vmatpush.msra.mxu2 %v2059_v38 }
  0xe7   : > { %1690 = vmatpush.xpose.msk.msrb.mxu0 %vm798_vm2, %v2047_v32 }
  0xe8   : > { %879 = vmatpush.msra.mxu2 %v2063_v40 }
  0xea   : > { %1658 = vmatpush.xpose.msk.msra.mxu1 %vm798_vm2, %v2051_v35  ;;  %880 = vmatpush.msra.mxu2 %v2070_v41 }
  0xeb   : > { %1691 = vmatpush.xpose.msk.msrb.mxu0 %vm798_vm2, %v2051_v35 }
  0xec   : > { %881 = vmatpush.msra.mxu2 %v2032_v13 }
  0xee   : > { %1659 = vmatpush.xpose.msk.msra.mxu1 %vm798_vm2, %v2059_v38  ;;  %956 = vmatpush.msrb.mxu2 %v2167_v3 }
  0xef   : > { %1692 = vmatpush.xpose.msk.msrb.mxu0 %vm798_vm2, %v2059_v38 }
  0xf0   : > { %957 = vmatpush.msrb.mxu2 %v2177_v5 }
  0xf2   : > { %1660 = vmatpush.xpose.msk.msra.mxu1 %vm798_vm2, %v2063_v40  ;;  %958 = vmatpush.msrb.mxu2 %v2189_v7 }
  0xf3   : > { %1693 = vmatpush.xpose.msk.msrb.mxu0 %vm798_vm2, %v2063_v40 }
  0xf4   : > { %959 = vmatpush.msrb.mxu2 %v2203_v9 }
  0xf6   : > { %1661 = vmatpush.xpose.msk.msra.mxu1 %vm798_vm2, %v2070_v41 }
  0xf7   : > { %1694 = vmatpush.xpose.msk.msrb.mxu0 %vm798_vm2, %v2070_v41 }
  0xfa   : > { %1662 = vmatpush.xpose.msk.msra.mxu1 %vm798_vm2, %v2032_v13 }
  0xfb   : > { %1695 = vmatpush.xpose.msk.msrb.mxu0 %vm798_vm2, %v2032_v13 }
  0xfd   : > { %1663 = vmatmul.msk.f32.vlgmr.msra.gmra.mxu1 %vm798_vm2, %v797_v44 }
  0xfe   : > { %1091 = vmatpush.msrb.mxu1 %v2036_v26 }
  0xff   : > { %1394 = vmatpush.msra.mxu0 %v2172_v4 }
 0x100   : > { %1092 = vmatpush.msrb.mxu1 %v2039_v29 }
 0x101   : > { %1395 = vmatpush.msra.mxu0 %v2184_v6 }
 0x102   : > { %1093 = vmatpush.msrb.mxu1 %v2047_v32 }
 0x103   : > { %1396 = vmatpush.msra.mxu0 %v2194_v8 }
 0x104   : > { %1094 = vmatpush.msrb.mxu1 %v2051_v35 }
 0x105   : > { %1397 = vmatpush.msra.mxu0 %v2208_v10 }
 0x106   : > { %1095 = vmatpush.msrb.mxu1 %v2059_v38 }
 0x108   : > { %1096 = vmatpush.msrb.mxu1 %v2063_v40 }
 0x10a   : > { %1097 = vmatpush.msrb.mxu1 %v2070_v41 }
 0x10c   : > { %1098 = vmatpush.msrb.mxu1 %v2032_v13 }
 0x10e   : > { %1167 = vmatpush.msra.mxu1 %v2167_v3 }
 0x110   : > { %1168 = vmatpush.msra.mxu1 %v2177_v5 }
 0x112   : > { %1169 = vmatpush.msra.mxu1 %v2189_v7 }
 0x114   : > { %1170 = vmatpush.msra.mxu1 %v2203_v9 }
 0x17a   : > { %v843_v46 = vpop.f32.mrf.mxu1 }
 0x17b   : > { %v846_v47 = vmul.f32 0.17677669, %v843_v46 }
 0x17d   : > { %v850_v48 = vadd.f32 %v2121_v45, %v846_v47  ;;  %v2295_v47 = vld [vmem:[%s2478_s16] ss:$0 sm:$0xff] }
 0x17f   : > { %v852_v49 = vsel %vm851_vm3, %v850_v48, -inf }
 0x180   : > { %853 = vmax.xlane.f32.xlu0 %v852_v49 }
 0x1f3   : > { %v854_v50 = vpop.xlane.xlu0 %853 }
 0x1f4   : > { %v855_v51 = vsub.f32 %v850_v48, %v854_v50 }
 0x1f6   : > { %v856_v52 = vmul.f32 1.442695, %v855_v51 }
 0x1f8   : > { %1762 = vpow2.f32 %v856_v52 }
 0x1fe   : > { %v1763_v53 = vpop.eup %1762 }
 0x1ff   : > { %v858_v54 = vsel %vm851_vm3, %v1763_v53, 0.0 }
 0x200   : > { %859 = vadd.xlane.f32.xlu0 %v858_v54 }
 0x273   : > { %v860_v58 = vpop.xlane.xlu0 %859 }
 0x274   : > { %1764 = vrcp.f32 %v860_v58 }
 0x27a   : > { %v1765_v59 = vpop.eup %1764 }
 0x27b   : > { %v862_v60 = vmul.f32 %v1765_v59, %v1763_v53 }
 0x27d   : > { %1664 = vmatmul.msk.f32.vlgmr.msra.gmra.mxu2 %vm851_vm3, %v862_v60 }
 0x27e   : > { %1010 = vmatpush.msra.mxu2 %v2249_v17 }
 0x280   : > { %1011 = vmatpush.msra.mxu2 %v2265_v23 }
 0x282   : > { %1012 = vmatpush.msra.mxu2 %v2271_v24 }
 0x284   : > { %1013 = vmatpush.msra.mxu2 %v2277_v25 }
 0x300   : > { %v883_v63 = vpop.f32.mrf.mxu2 }
 0x301   : > { %1665 = vmatmul.msk.f32.vlgmr.msra.gmra.mxu3 %vm798_vm2, %v883_v63 }
 0x302   : > { %983 = vmatpush.msra.mxu3 %v2172_v4 }
 0x304   : > { %984 = vmatpush.msra.mxu3 %v2184_v6 }
 0x306   : > { %985 = vmatpush.msra.mxu3 %v2194_v8 }
 0x308   : > { %986 = vmatpush.msra.mxu3 %v2208_v10 }
 0x384   : > { %v906_v12 = vpop.f32.mrf.mxu3 }
 0x385   : > { %v909_v14 = vadd.f32 %v906_v12, %v2098_v43 }
 0x387   : > { %v913_v15 = vadd.f32 %v1754_v11, %v909_v14  ;;  %v2307_v11 = vld [vmem:[%s2479_s17] ss:$0 sm:$0xff] }
 0x389   : > { %1766 = vtanh.f32 %v913_v15 }
 0x38f   : > { %v2224_v16 = vpop.eup %1766 }
 0x390   : > { %1666 = vmatmul.msk.f32.vlgmr.msrb.gmra.mxu3 %vm798_vm2, %v2224_v16  ;;  %1667 = vmatmul.msk.f32.vlgmr.msrb.gmra.mxu2 %vm798_vm2, %v2224_v16  ;;  %v1043_v22 = vadd.f32 %v2224_v16, %v2096_v42 }
 0x391   : > { %1671 = vmatpush.xpose.msk.msrb.mxu3 %vm798_vm2, %v2036_v26 }
 0x395   : > { %1672 = vmatpush.xpose.msk.msrb.mxu3 %vm798_vm2, %v2039_v29 }
 0x399   : > { %1673 = vmatpush.xpose.msk.msrb.mxu3 %vm798_vm2, %v2047_v32 }
 0x39d   : > { %1674 = vmatpush.xpose.msk.msrb.mxu3 %vm798_vm2, %v2051_v35 }
 0x3a1   : > { %1675 = vmatpush.xpose.msk.msrb.mxu3 %vm798_vm2, %v2059_v38 }
 0x3a5   : > { %1676 = vmatpush.xpose.msk.msrb.mxu3 %vm798_vm2, %v2063_v40 }
 0x3a9   : > { %1677 = vmatpush.xpose.msk.msrb.mxu3 %vm798_vm2, %v2070_v41 }
 0x3ad   : > { %1678 = vmatpush.xpose.msk.msrb.mxu3 %vm798_vm2, %v2032_v13 }
 0x413   : > { %v961_v19 = vpop.f32.mrf.mxu2  ;;  %v938_v27 = vpop.f32.mrf.mxu3 }
 0x414   : > { %v962_v20 = vadd.f32 %v2255_v18, %v961_v19  ;;  %v939_v19 = vadd.f32 %v2302_v61, %v938_v27  ;;  %v766_v27 = vld [vmem:[%s2504_s7 + $0x28] sm:$0xff] }
 0x416   : > { %v964_v21 = vmax.f32 %v962_v20, 0.0 }
 0x418   : > { %1668 = vmatmul.msk.f32.vlgmr.msra.gmra.mxu3 %vm798_vm2, %v964_v21 }
 0x420   : > { %1679 = vmatmul.msk.f32.vlgmr.msrb.gmra.mxu3 %vm798_vm2, %v1043_v22  ;;  %v768_v22 = vld [vmem:[%s2504_s7 + $0x38] sm:$0xff] }
 0x421   : > { %1118 = vmatpush.msrb.mxu2 %v768_v22 }
 0x49b   : > { %v988_v30 = vpop.f32.mrf.mxu3 }
 0x49c   : > { %v989_v31 = vadd.f32 %v2283_v28, %v988_v30  ;;  %v767_v30 = vld [vmem:[%s2504_s7 + $0x30] sm:$0xff] }
 0x49d   : > { %1119 = vmatpush.msrb.mxu2 %v767_v30 }
 0x49e   : > { %v991_v33 = vmax.f32 %v989_v31, 0.0  ;;  %v765_v31 = vld [vmem:[%s2504_s7 + $0x20] sm:$0xff] }
 0x49f   : > { %1120 = vmatpush.msrb.mxu2 %v766_v27 }
 0x4a0   : > { %1669 = vmatmul.msk.f32.vlgmr.msra.gmra.mxu2 %vm798_vm2, %v991_v33 }
 0x4a1   : > { %1121 = vmatpush.msrb.mxu2 %v765_v31 }
 0x4a3   : > { %v1064_v34 = vpop.f32.mrf.mxu3  ;;  %1147 = vmatpush.msra.mxu2 %v2142_v62 }
 0x4a4   : > { %v1067_v36 = vmul.f32 0.17677669, %v1064_v34 }
 0x4a5   : > { %1148 = vmatpush.msra.mxu2 %v2149_v0 }
 0x4a6   : > { %v1068_v37 = vadd.f32 %v2121_v45, %v1067_v36 }
 0x4a7   : > { %1149 = vmatpush.msra.mxu2 %v2155_v1 }
 0x4a8   : > { %v1069_v39 = vsel %vm851_vm3, %v1068_v37, -inf }
 0x4a9   : > { %1070 = vmax.xlane.f32.xlu1 %v1069_v39  ;;  %1150 = vmatpush.msra.mxu2 %v2161_v2  ;;  %v1760_v39 = vld [vmem:[%s2506_s8 + $0x1] ss:$0 sm:$0xff] }
 0x51c   : > { %v1071_v43 = vpop.xlane.xlu1 %1070 }
 0x51d   : > { %v1072_v44 = vsub.f32 %v1068_v37, %v1071_v43 }
 0x51f   : > { %v1073_v46 = vmul.f32 1.442695, %v1072_v44 }
 0x521   : > { %1768 = vpow2.f32 %v1073_v46 }
 0x523   : > { %v1015_v48 = vpop.f32.mrf.mxu2 }
 0x524   : > { %v1016_v49 = vadd.f32 %v2295_v47, %v1015_v48 }
 0x526   : > { %v1670_v50 = vmul.f32 -1.442695, %v1016_v49 }
 0x527   : > { %v1769_v51 = vpop.eup %1768 }
 0x528   : > { %1770 = vpow2.f32 %v1670_v50  ;;  %v1075_v52 = vsel %vm851_vm3, %v1769_v51, 0.0 }
 0x529   : > { %1076 = vadd.xlane.f32.xlu1 %v1075_v52 }
 0x52e   : > { %v1771_v53 = vpop.eup %1770 }
 0x52f   : > { %v1021_v54 = vadd.f32 1.0, %v1771_v53 }
 0x531   : > { %1772 = vrcp.f32 %v1021_v54  ;;  %v1033_v58 = vand.u32 2147483648, %v1021_v54  ;;  %v1031_v60 = vand.u32 2147483647, %v1021_v54  ;;  %vm1027_vm5 = vweird.f32 %v1021_v54 }
 0x533   : > { %v1034_v12 = vor.u32 1.1754944e-38, %v1033_v58  ;;  %vm1032_vm7 = vcmp.eq.f32.partialorder %v1031_v60, 8.507059e+37 }
 0x537   : > { %v1773_v55 = vpop.eup %1772 }
 0x538   : > { %v1023_v56 = vmul.f32 %v1773_v55, %v1021_v54  ;;  %vm1028_vm4 = vweird.f32 %v1773_v55 }
 0x539   : > { %vm1029_vm6 = vmor %vm1027_vm5, %vm1028_vm4 }
 0x53a   : > { %v1024_v57 = vsub.f32 1.0, %v1023_v56 }
 0x53c   : > { %v1025_v59 = vmul.f32 %v1773_v55, %v1024_v57 }
 0x53e   : > { %v1026_v63 = vadd.f32 %v1773_v55, %v1025_v59 }
 0x540   : > { %v1030_v14 = vsel %vm1029_vm6, %v1773_v55, %v1026_v63 }
 0x541   : > { %v1035_v15 = vsel %vm1032_vm7, %v1034_v12, %v1030_v14 }
 0x542   : > { %v1040_v20 = vmul.f32 %v2307_v11, %v1035_v15 }
 0x544   : > { %v1041_v21 = vadd.f32 %v1040_v20, %v939_v19  ;;  %v1761_v19 = vld [vmem:[%s2506_s8 + $0x2] ss:$0 sm:$0xff] }
 0x546   : > { %1042 = vst [vmem:[%s2312_s29] sm:$0xff] %v1041_v21 }
 0x59c   : > { %v1077_v33 = vpop.xlane.xlu1 %1076 }
 0x59d   : > { %1774 = vrcp.f32 %v1077_v33 }
 0x5a3   : > { %v1775_v34 = vpop.eup %1774 }
 0x5a4   : > { %v1079_v36 = vmul.f32 %v1775_v34, %v1769_v51 }
 0x5a6   : > { %1680 = vmatmul.msk.f32.vlgmr.msrb.gmra.mxu1 %vm851_vm3, %v1079_v36 }
 0x5a7   : > { %1215 = vmatpush.msrb.mxu1 %v2249_v17 }
 0x5a9   : > { %1216 = vmatpush.msrb.mxu1 %v2265_v23 }
 0x5ab   : > { %1217 = vmatpush.msrb.mxu1 %v2271_v24 }
 0x5ad   : > { %1218 = vmatpush.msrb.mxu1 %v2277_v25 }
 0x623   : > { %v1100_v37 = vpop.f32.mrf.mxu1 }
 0x624   : > { %1681 = vmatmul.msk.f32.vlgmr.msrb.gmra.mxu2 %vm798_vm2, %v1100_v37 }
 0x625   : > { %1191 = vmatpush.msrb.mxu2 %v2172_v4 }
 0x627   : > { %1192 = vmatpush.msrb.mxu2 %v2184_v6 }
 0x629   : > { %1193 = vmatpush.msrb.mxu2 %v2194_v8 }
 0x62b   : > { %1194 = vmatpush.msrb.mxu2 %v2208_v10 }
 0x6a7   : > { %v1123_v43 = vpop.f32.mrf.mxu2 }
 0x6a8   : > { %v1126_v44 = vadd.f32 %v2224_v16, %v1123_v43 }
 0x6aa   : > { %v1130_v46 = vadd.f32 %v1760_v39, %v1126_v44 }
 0x6ac   : > { %1776 = vtanh.f32 %v1130_v46 }
 0x6b2   : > { %v2345_v48 = vpop.eup %1776 }
 0x6b3   : > { %1682 = vmatmul.msk.f32.vlgmr.msra.gmra.mxu2 %vm798_vm2, %v2345_v48  ;;  %1683 = vmatmul.msk.f32.vlgmr.msra.gmra.mxu1 %vm798_vm2, %v2345_v48  ;;  %v1246_v4 = vadd.f32 %v2345_v48, %v2096_v42 }
 0x6b4   : > { %1294 = vmatpush.msra.mxu2 %v2036_v26  ;;  %1350 = vmatpush.msra.mxu1 %v2142_v62 }
 0x6b5   : > { %1696 = vmatmul.msk.f32.vlgmr.msrb.gmra.mxu0 %vm798_vm2, %v1246_v4 }
 0x6b6   : > { %1295 = vmatpush.msra.mxu2 %v2039_v29  ;;  %1351 = vmatpush.msra.mxu1 %v2149_v0 }
 0x6b8   : > { %1296 = vmatpush.msra.mxu2 %v2047_v32  ;;  %1352 = vmatpush.msra.mxu1 %v2155_v1 }
 0x6ba   : > { %1297 = vmatpush.msra.mxu2 %v2051_v35  ;;  %1353 = vmatpush.msra.mxu1 %v2161_v2 }
 0x6bc   : > { %1298 = vmatpush.msra.mxu2 %v2059_v38 }
 0x6be   : > { %1299 = vmatpush.msra.mxu2 %v2063_v40 }
 0x6c0   : > { %1300 = vmatpush.msra.mxu2 %v2070_v41 }
 0x6c2   : > { %1301 = vmatpush.msra.mxu2 %v2032_v13 }
 0x730   : > { %v1172_v26 = vpop.f32.mrf.mxu1 }
 0x731   : > { %v1173_v29 = vadd.f32 %v2255_v18, %v1172_v26 }
 0x732   : > { %v1267_v42 = vpop.f32.mrf.mxu0 }
 0x733   : > { %v1175_v62 = vmax.f32 %v1173_v29, 0.0  ;;  %v1270_v32 = vmul.f32 0.17677669, %v1267_v42 }
 0x735   : > { %1684 = vmatmul.msk.f32.vlgmr.msrb.gmra.mxu2 %vm798_vm2, %v1175_v62  ;;  %v1271_v35 = vadd.f32 %v2121_v45, %v1270_v32 }
 0x736   : > { %v1152_v2 = vpop.f32.mrf.mxu2 }
 0x737   : > { %v1272_v0 = vsel %vm851_vm3, %v1271_v35, -inf }
 0x738   : > { %1273 = vmax.xlane.f32.xlu2 %v1272_v0 }
 0x7ab   : > { %v1274_v38 = vpop.xlane.xlu2 %1273 }
 0x7ac   : > { %v1275_v1 = vsub.f32 %v1271_v35, %v1274_v38 }
 0x7ae   : > { %v1276_v40 = vmul.f32 1.442695, %v1275_v1 }
 0x7b0   : > { %1778 = vpow2.f32 %v1276_v40 }
 0x7b6   : > { %v1779_v41 = vpop.eup %1778 }
 0x7b7   : > { %v1278_v13 = vsel %vm851_vm3, %v1779_v41, 0.0 }
 0x7b8   : > { %1279 = vadd.xlane.f32.xlu2 %v1278_v13  ;;  %v1196_v6 = vpop.f32.mrf.mxu2 }
 0x7b9   : > { %v1197_v8 = vadd.f32 %v2283_v28, %v1196_v6 }
 0x7bb   : > { %v1199_v10 = vmax.f32 %v1197_v8, 0.0 }
 0x7bd   : > { %1685 = vmatmul.msk.f32.vlgmr.msrb.gmra.mxu1 %vm798_vm2, %v1199_v10 }
 0x7be   : > { %1418 = vmatpush.msrb.mxu1 %v2249_v17  ;;  %v772_v17 = vld [vmem:[%s2504_s7 + $0x58] sm:$0xff] }
 0x7bf   : > { %1321 = vmatpush.msra.mxu3 %v772_v17 }
 0x7c0   : > { %1419 = vmatpush.msrb.mxu1 %v2265_v23  ;;  %v771_v23 = vld [vmem:[%s2504_s7 + $0x50] sm:$0xff] }
 0x7c1   : > { %1322 = vmatpush.msra.mxu3 %v771_v23 }
 0x7c2   : > { %1420 = vmatpush.msrb.mxu1 %v2271_v24  ;;  %v770_v24 = vld [vmem:[%s2504_s7 + $0x48] sm:$0xff] }
 0x7c3   : > { %1323 = vmatpush.msra.mxu3 %v770_v24 }
 0x7c4   : > { %1421 = vmatpush.msrb.mxu1 %v2277_v25  ;;  %v769_v25 = vld [vmem:[%s2504_s7 + $0x40] sm:$0xff] }
 0x7c5   : > { %1324 = vmatpush.msra.mxu3 %v769_v25 }
 0x7c7   : > { %1370 = vmatpush.msrb.mxu3 %v2167_v3 }
 0x7c9   : > { %1371 = vmatpush.msrb.mxu3 %v2177_v5 }
 0x7cb   : > { %1372 = vmatpush.msrb.mxu3 %v2189_v7  ;;  %v1153_v7 = vadd.f32 %v2302_v61, %v1152_v2  ;;  %v1496_v2 = vld [vmem:[%s2312_s29] sm:$0xff] (%p1994_p5) }
 0x7cc   : > { %1497 = vst [vmem:[%s1463_s4] sm:$0xff] (%p1994_p5), %v1496_v2 }
 0x7cd   : > { %1373 = vmatpush.msrb.mxu3 %v2203_v9 }
 0x82b   : > { %v1280_v45 = vpop.xlane.xlu2 %1279 }
 0x82c   : > { %1780 = vrcp.f32 %v1280_v45 }
 0x832   : > { %v1781_v16 = vpop.eup %1780 }
 0x833   : > { %v1282_v49 = vmul.f32 %v1781_v16, %v1779_v41 }
 0x835   : > { %1697 = vmatmul.msk.f32.vlgmr.msra.gmra.mxu2 %vm851_vm3, %v1282_v49 }
 0x83a   : > { %v1220_v50 = vpop.f32.mrf.mxu1 }
 0x83b   : > { %v1221_v51 = vadd.f32 %v2295_v47, %v1220_v50 }
 0x83d   : > { %v1686_v52 = vmul.f32 -1.442695, %v1221_v51 }
 0x83f   : > { %1782 = vpow2.f32 %v1686_v52 }
 0x845   : > { %v1783_v53 = vpop.eup %1782 }
 0x846   : > { %v1226_v54 = vadd.f32 1.0, %v1783_v53 }
 0x848   : > { %1784 = vrcp.f32 %v1226_v54  ;;  %v1238_v58 = vand.u32 2147483648, %v1226_v54  ;;  %v1236_v60 = vand.u32 2147483647, %v1226_v54  ;;  %vm1232_vm9 = vweird.f32 %v1226_v54 }
 0x84a   : > { %v1239_v3 = vor.u32 1.1754944e-38, %v1238_v58  ;;  %vm1237_vm11 = vcmp.eq.f32.partialorder %v1236_v60, 8.507059e+37 }
 0x84e   : > { %v1785_v55 = vpop.eup %1784 }
 0x84f   : > { %v1228_v56 = vmul.f32 %v1785_v55, %v1226_v54  ;;  %vm1233_vm8 = vweird.f32 %v1785_v55 }
 0x850   : > { %vm1234_vm10 = vmor %vm1232_vm9, %vm1233_vm8 }
 0x851   : > { %v1229_v57 = vsub.f32 1.0, %v1228_v56 }
 0x853   : > { %v1230_v59 = vmul.f32 %v1785_v55, %v1229_v57 }
 0x855   : > { %v1231_v63 = vadd.f32 %v1785_v55, %v1230_v59 }
 0x857   : > { %v1235_v12 = vsel %vm1234_vm10, %v1785_v55, %v1231_v63 }
 0x858   : > { %v1240_v5 = vsel %vm1237_vm11, %v1239_v3, %v1235_v12 }
 0x859   : > { %v1242_v9 = vmul.f32 %v2307_v11, %v1240_v5 }
 0x85b   : > { %v1243_v14 = vadd.f32 %v1242_v9, %v1153_v7 }
 0x85d   : > { %1687 = vst [vmem:[%s2312_s29 + $0x8] sm:$0xff] %v1243_v14 }
 0x864   : > { %v1498_v41 = vld [vmem:[%s2312_s29 + $0x8] sm:$0xff] (%p1994_p5) }
 0x865   : > { %1499 = vst [vmem:[%s1463_s4 + $0x10] sm:$0xff] (%p1994_p5), %v1498_v41 }
 0x8b8   : > { %v1303_v15 = vpop.f32.mrf.mxu2 }
 0x8b9   : > { %1698 = vmatmul.msk.f32.vlgmr.msra.gmra.mxu3 %vm798_vm2, %v1303_v15 }
 0x93c   : > { %v1326_v20 = vpop.f32.mrf.mxu3 }
 0x93d   : > { %v1329_v21 = vadd.f32 %v2345_v48, %v1326_v20 }
 0x93f   : > { %v1333_v22 = vadd.f32 %v1761_v19, %v1329_v21 }
 0x941   : > { %1786 = vtanh.f32 %v1333_v22 }
 0x947   : > { %v1787_v30 = vpop.eup %1786 }
 0x948   : > { %1449 = vst.msk [vmem:[%s2404_s28] sm:$0xff] %vm798_vm2, %v1787_v30  ;;  %1699 = vmatmul.msk.f32.vlgmr.msra.gmra.mxu1 %vm798_vm2, %v1787_v30  ;;  %1700 = vmatmul.msk.f32.vlgmr.msrb.gmra.mxu3 %vm798_vm2, %v1787_v30 }
 0x9c5   : > { %v1355_v39 = vpop.f32.mrf.mxu1 }
 0x9c6   : > { %v1356_v38 = vadd.f32 %v2302_v61, %v1355_v39 }
 0x9cb   : > { %v1375_v27 = vpop.f32.mrf.mxu3 }
 0x9cc   : > { %v1376_v31 = vadd.f32 %v2255_v18, %v1375_v27 }
 0x9ce   : > { %v1378_v33 = vmax.f32 %v1376_v31, 0.0 }
 0x9d0   : > { %1701 = vmatmul.msk.f32.vlgmr.msra.gmra.mxu0 %vm798_vm2, %v1378_v33 }
 0xa4d   : > { %v1399_v34 = vpop.f32.mrf.mxu0 }
 0xa4e   : > { %v1400_v36 = vadd.f32 %v2283_v28, %v1399_v34 }
 0xa50   : > { %v1402_v37 = vmax.f32 %v1400_v36, 0.0 }
 0xa52   : > { %1702 = vmatmul.msk.f32.vlgmr.msrb.gmra.mxu1 %vm798_vm2, %v1402_v37 }
 0xacf   : > { %v1423_v43 = vpop.f32.mrf.mxu1 }
 0xad0   : > { %v1424_v44 = vadd.f32 %v2295_v47, %v1423_v43 }
 0xad2   : > { %v1703_v46 = vmul.f32 -1.442695, %v1424_v44 }
 0xad4   : > { %1788 = vpow2.f32 %v1703_v46 }
 0xada   : > { %v1789_v48 = vpop.eup %1788 }
 0xadb   : > { %v1429_v4 = vadd.f32 1.0, %v1789_v48 }
 0xadd   : > { %1790 = vrcp.f32 %v1429_v4  ;;  %v1441_v42 = vand.u32 2147483648, %v1429_v4  ;;  %v1439_v28 = vand.u32 2147483647, %v1429_v4  ;;  %vm1435_vm13 = vweird.f32 %v1429_v4 }
 0xadf   : > { %v1442_v35 = vor.u32 1.1754944e-38, %v1441_v42  ;;  %vm1440_vm15 = vcmp.eq.f32.partialorder %v1439_v28, 8.507059e+37 }
 0xae3   : > { %v1791_v26 = vpop.eup %1790 }
 0xae4   : > { %v1431_v18 = vmul.f32 %v1791_v26, %v1429_v4  ;;  %vm1436_vm12 = vweird.f32 %v1791_v26 }
 0xae5   : > { %vm1437_vm14 = vmor %vm1435_vm13, %vm1436_vm12 }
 0xae6   : > { %v1432_v29 = vsub.f32 1.0, %v1431_v18 }
 0xae8   : > { %v1433_v62 = vmul.f32 %v1791_v26, %v1432_v29 }
 0xaea   : > { %v1434_v32 = vadd.f32 %v1791_v26, %v1433_v62 }
 0xaec   : > { %v1438_v0 = vsel %vm1437_vm14, %v1791_v26, %v1434_v32 }
 0xaed   : > { %v1443_v47 = vsel %vm1440_vm15, %v1442_v35, %v1438_v0 }
 0xaee   : > { %v1445_v1 = vmul.f32 %v2307_v11, %v1443_v47  ;;  %1461 = sbr.rel (!%p1994_p5) target bundleno = 2811 (0xafb), region = 96 }
 0xaf0   : > { %v1446_v40 = vadd.f32 %v1445_v1, %v1356_v38 }
 0xaf2   : > { %1704 = vst [vmem:[%s2312_s29 + $0x10] sm:$0xff] %v1446_v40 }
 0xaf9   : > { %v1500_v61 = vld [vmem:[%s2312_s29 + $0x10] sm:$0xff] }
 0xafa   : > { %1501 = vst [vmem:[%s1463_s4 + $0x20] sm:$0xff] %v1500_v61 }
 0xafb PF: > { %s1707_s6 = sshll.u32 %s1977_s1, 3  ;;  %s1513_s22 = sshll.u32 %s2404_s28, 4  ;;  %s1514_s22 = int_to_ptr.vmem [resolvable:$true] %s1513_s22 }
 0xafc   : > { %s1511_s7 = scalar_lea.hbm %s2481_s19, %s1707_s6  ;;  %s1812_s20 = scalar_lea.hbm %s2481_s19, 16 }
 0xafd   : > { %s1515_s8 = sshll.u32 %s1511_s7, 4  ;;  %s1516_s8 = int_to_ptr.hbm [resolvable:$true] %s1515_s8 }
 0xafe   : > { %s1806_s9 = sshra.s32 %s1516_s8, 4  ;;  %s1807_s9 = int_to_ptr.hbm [resolvable:$true] %s1806_s9 }
 0xaff   : > { %s1808_s24 = scalar_lea.hbm %s1807_s9, 8  ;;  %p1813_p0 = scmp.lt.s32.totalorder %s1807_s9, %s2481_s19 }
 0xb00   : > { %p1809_p11 = scmp.ne.s32.totalorder %s1807_s9, %s1808_s24  ;;  %p1814_p1 = scmp.lt.s32.totalorder %s1812_s20, %s1808_s24 }
 0xb02   : > { %p1810_p12 = pnand %p1809_p11, %p1994_p5  ;;  %p1815_p2 = por %p1814_p1, %p1813_p0 }
 0xb04   : > { %p1811_p13 = pneg %p1810_p12 }
 0xb06   : > { %p1816_p3 = pnand %p1815_p2, %p1811_p13 }
 0xb08   : > { %1819 = shalt.err (!%p1816_p3)
}
 0xb09   : > { %s2507_s7 = scalar_lea.sflag [#allocation4], %s2290_s25 }
 0xb0a   : > { %1713 = dma.vmem_to_hbm [thread:$0]  (%p1994_p5), %s1514_s22, 128, %s1516_s8, %s2507_s7  }
 0xb0b PF: > { %p1719_p4 = scmp.ge.s32.totalorder %s1854_s21, 2  ;;  %s1534_s23 = sand.u32 1, %s1842_s0  }
 0xb0c   : > { %s1535_s4 = scalar_lea.sflag [#allocation4], %s1534_s23 }
 0xb0d   : > { %p1716_p7 = pnand %p1719_p4, %p1998_p6 }
 0xb0f   : > { %p1717_p8 = pneg %p1716_p7 }
 0xb11   : > { %1837 = dma.done.wait (%p1717_p8), %s1535_s4, 128  }
 0xb12   : > { %1839 = vsyncadd (%p1717_p8), %s1535_s4, 4294967168  ;;  %s2508_s9 = sld [smem:[#allocation6_spill]]  ;;  %p30_p9 = scmp.ge.s32.totalorder %s1981_s2, 4  }
 0xb13   : > { %s2509_s20 = sld [smem:[#allocation7_spill]]  ;;  %s2510_s0 = smov %s1846_s30 }
 0xb14   : > { %s2512_s21 = smov %s1981_s2  ;;  %32 = sbr.rel (!%p30_p9) target bundleno = 14 (0xe), region = 188 }
 0xb18   : > { %s2511_s30 = smov %s2508_s9 }
 0xb19   :  { %1541 = vsyncpa [#allocation4], 1 }
 0xb1a   :  { %1543 = vsyncpa [#allocation4 + $0x1], 1 }

</bundles_post_ra>
